<compile_context>
chip_gen: v6e
topology: v6e:2x2x1
jax: 0.10.0
libtpu: 0.0.40
codegen_flags: <defaults>
</compile_context>

<pallas_src>
import jax
import jax.numpy as jnp
from jax import lax
from jax.experimental import pallas as pl
from jax.experimental.pallas import tpu as pltpu


def simple_model_kernel(x_ref, fw_ref, b1_ref, w2_ref, o_ref):
    # x_ref:  (TB, P_pad)    input batch tile (zero-padded columns beyond P)
    # fw_ref: (P_pad, L_pad) fused weight = projection @ layer1.weight^T (padded)
    # b1_ref: (1, L_pad)     layer1.bias (padded; column L holds 1.0 for the b2 trick)
    # w2_ref: (1, L_pad)     layer2.weight row (padded; column L holds b2)
    # o_ref:  (TB, 128)      lane-dense output slab; column 0 carries the result
    h = jnp.dot(x_ref[...], fw_ref[...], preferred_element_type=jnp.float32)
    h = jnp.maximum(h + b1_ref[...], 0.0)                   # layer1 + ReLU (VPU)
    out = jnp.sum(h * w2_ref[...], axis=-1, keepdims=True)  # layer2 matvec + b2 (VPU/XLU)
    o_ref[...] = jnp.broadcast_to(out, o_ref.shape).astype(o_ref.dtype)


def _round_up(n, m):
    return ((n + m - 1) // m) * m


def simple_model_forward(x, proj, w1, b1, w2, b2, *, tb=128,
                         compute_dtype=jnp.float32):
    """x: (B, P) with P == proj.shape[0] == (L+1)^2. Returns (B, 1)."""
    B, P = x.shape
    L = proj.shape[1]
    assert proj.shape[0] == P and w1.shape == (L, L)

    # --- exact algebraic fusion of the two pre-ReLU linear maps --------------
    # relu((x @ proj) @ W1^T + b1) == relu(x @ (proj @ W1^T) + b1)
    fused_w = jnp.dot(jnp.asarray(proj, jnp.float32),
                      jnp.asarray(w1, jnp.float32).T,
                      precision=lax.Precision.HIGHEST)            # (P, L)

    # --- lane/sublane friendly zero padding (exact) --------------------------
    P_pad = _round_up(P, 128)                   # clean K tiles on the MXU
    L_pad = _round_up(max(L + 1, 128), 128)     # lane-dense; +1 spare col for b2
    B_pad = _round_up(B, tb)

    x_p = jnp.zeros((B_pad, P_pad), jnp.float32).at[:B, :P].set(
        jnp.asarray(x, jnp.float32))
    fw_p = jnp.zeros((P_pad, L_pad), jnp.float32).at[:P, :L].set(fused_w)
    b1_p = jnp.zeros((1, L_pad), jnp.float32).at[0, :L].set(
        jnp.asarray(b1, jnp.float32).reshape(L))
    w2_p = jnp.zeros((1, L_pad), jnp.float32).at[0, :L].set(
        jnp.asarray(w2, jnp.float32).reshape(L))
    # Fold layer2.bias into the spare padded column L:
    #   h[:, L] = relu(0 + 1.0) = 1.0, contributes 1.0 * b2 to the reduction.
    b2_val = jnp.asarray(b2, jnp.float32).reshape(-1)[0]
    b1_p = b1_p.at[0, L].set(1.0)
    w2_p = w2_p.at[0, L].set(b2_val)

    # Optional bf16 inputs for the dominant matmul (v6e/v7x); f32 accumulate.
    if compute_dtype != jnp.float32:
        x_p = x_p.astype(compute_dtype)
        fw_p = fw_p.astype(compute_dtype)

    out_pad = pl.pallas_call(
        simple_model_kernel,
        out_shape=jax.ShapeDtypeStruct((B_pad, 128), jnp.float32),
        grid_spec=pltpu.PrefetchScalarGridSpec(
            num_scalar_prefetch=0,
            grid=(B_pad // tb,),
            in_specs=[
                pl.BlockSpec((tb, P_pad), lambda i: (i, 0)),     # x tile over batch
                pl.BlockSpec((P_pad, L_pad), lambda i: (0, 0)),  # fused weight (resident)
                pl.BlockSpec((1, L_pad), lambda i: (0, 0)),      # b1 (+ 1.0 marker col)
                pl.BlockSpec((1, L_pad), lambda i: (0, 0)),      # w2 row (+ b2 col)
            ],
            out_specs=pl.BlockSpec((tb, 128), lambda i: (i, 0)),
        ),
        compiler_params=pltpu.CompilerParams(
            dimension_semantics=("parallel",),
        ),
    )(x_p, fw_p, b1_p, w2_p)

    # Column 0 of the lane-dense slab is the (B, 1) result; drop pad rows.
    return out_pad[:B, 0:1].astype(x.dtype)


def init_params(key, layers_size):
    """Deterministic synthetic params mirroring SimpleModel.__init__ shapes."""
    L = layers_size
    num_params = L * L + L + L + 1  # layer1.W + layer1.b + layer2.W + layer2.b = (L+1)^2
    k1, k2, k3, k4, k5 = jax.random.split(key, 5)
    bound = 1.0 / jnp.sqrt(L)
    w1 = jax.random.uniform(k1, (L, L), jnp.float32, -bound, bound)   # layer1.weight
    b1 = jax.random.uniform(k2, (L,), jnp.float32, -bound, bound)     # layer1.bias
    w2 = jax.random.uniform(k3, (1, L), jnp.float32, -bound, bound)   # layer2.weight
    b2 = jax.random.uniform(k4, (1,), jnp.float32, -bound, bound)     # layer2.bias
    # projection = nn.Linear(L, num_params).weight -> shape (num_params, L)
    proj = jax.random.uniform(k5, (num_params, L), jnp.float32, -bound, bound)
    return proj, w1, b1, w2, b2, num_params


def reference_forward(x, proj, w1, b1, w2, b2):
    h = x @ proj
    h = jnp.maximum(h @ w1.T + b1, 0.0)
    return h @ w2.T + b2


if __name__ == "__main__":
    layers_size = 32          # small, consistent with the layers_size hyperparam
    key = jax.random.PRNGKey(0)
    kp, kx = jax.random.split(key)
    proj, w1, b1, w2, b2, num_params = init_params(kp, layers_size)

    # Small batch in "parameter index" space (as predict_own_weights uses).
    batch = 8
    x = jax.random.normal(kx, (batch, num_params), jnp.float32)
    out = jax.block_until_ready(simple_model_forward(x, proj, w1, b1, w2, b2))
    ref = reference_forward(x, proj, w1, b1, w2, b2)
    assert out.shape == (batch, 1)
    assert jnp.allclose(out, ref, atol=1e-3, rtol=1e-3)

    # Larger batch: exercises 2 grid steps so both v7x TensorCores get work.
    batch2 = 256
    x2 = jax.random.normal(jax.random.PRNGKey(1), (batch2, num_params), jnp.float32)
    out2 = jax.block_until_ready(
        simple_model_forward(x2, proj, w1, b1, w2, b2, tb=128))
    ref2 = reference_forward(x2, proj, w1, b1, w2, b2)
    assert out2.shape == (batch2, 1)
    assert jnp.allclose(out2, ref2, atol=1e-3, rtol=1e-3)

    print("KERNEL_OK")
</pallas_src>

<mosaic_0001>
module attributes {stable_mosaic.version = 11 : i64} {
  func.func @simple_model_kernel(%arg0: i32, %arg1: memref<128x1152xf32, #tpu.memory_space<vmem>>, %arg2: memref<1152x128xf32, #tpu.memory_space<vmem>>, %arg3: memref<1x128xf32, #tpu.memory_space<vmem>>, %arg4: memref<1x128xf32, #tpu.memory_space<vmem>>, %arg5: memref<128x128xf32, #tpu.memory_space<vmem>>) attributes {dimension_semantics = [#tpu.dimension_semantics<parallel>], iteration_bounds = array<i64: 1>, scalar_prefetch = 0 : i64, scratch_operands = 0 : i64, tpu.core_type = #tpu.core_type<tc>, window_params = [{transform_indices = @transform_0, window_bounds = array<i64: 128, 1152>}, {pipeline_mode = #tpu.pipeline_mode<synchronous>, transform_indices = @transform_1, window_bounds = array<i64: 1152, 128>}, {pipeline_mode = #tpu.pipeline_mode<synchronous>, transform_indices = @transform_2, window_bounds = array<i64: 1, 128>}, {pipeline_mode = #tpu.pipeline_mode<synchronous>, transform_indices = @transform_3, window_bounds = array<i64: 1, 128>}, {transform_indices = @transform_4, window_bounds = array<i64: 128, 128>}]} {
    %c0 = arith.constant 0 : index
    %c0_0 = arith.constant 0 : index
    %0 = vector.load %arg1[%c0, %c0_0] : memref<128x1152xf32, #tpu.memory_space<vmem>>, vector<128x1152xf32>
    %c0_1 = arith.constant 0 : index
    %c0_2 = arith.constant 0 : index
    %1 = vector.load %arg2[%c0_1, %c0_2] : memref<1152x128xf32, #tpu.memory_space<vmem>>, vector<1152x128xf32>
    %cst = arith.constant dense<0.000000e+00> : vector<128x128xf32>
    %2 = tpu.matmul %0, %1, %cst {dimension_numbers = #tpu.dot_dimension_numbers<[1], [0], [0], [1], [0, 0, 1, 1], [], []>} : vector<128x1152xf32>, vector<1152x128xf32>, vector<128x128xf32> -> vector<128x128xf32>
    %c0_3 = arith.constant 0 : index
    %c0_4 = arith.constant 0 : index
    %3 = vector.load %arg3[%c0_3, %c0_4] : memref<1x128xf32, #tpu.memory_space<vmem>>, vector<1x128xf32>
    %4 = vector.broadcast %3 : vector<1x128xf32> to vector<128x128xf32>
    %5 = arith.addf %2, %4 : vector<128x128xf32>
    %cst_5 = arith.constant 0.000000e+00 : f32
    %6 = vector.broadcast %cst_5 : f32 to vector<128x128xf32>
    %7 = arith.maximumf %5, %6 : vector<128x128xf32>
    %c0_6 = arith.constant 0 : index
    %c0_7 = arith.constant 0 : index
    %8 = vector.load %arg4[%c0_6, %c0_7] : memref<1x128xf32, #tpu.memory_space<vmem>>, vector<1x128xf32>
    %9 = vector.broadcast %8 : vector<1x128xf32> to vector<128x128xf32>
    %10 = arith.mulf %7, %9 : vector<128x128xf32>
    %cst_8 = arith.constant dense<0.000000e+00> : vector<128xf32>
    %11 = vector.multi_reduction <add>, %10, %cst_8 [1] : vector<128x128xf32> to vector<128xf32>
    %12 = vector.shape_cast %11 : vector<128xf32> to vector<128x1xf32>
    %13 = vector.shape_cast %12 : vector<128x1xf32> to vector<128x1xf32>
    %14 = vector.broadcast %13 : vector<128x1xf32> to vector<128x128xf32>
    %c0_9 = arith.constant 0 : index
    %c0_10 = arith.constant 0 : index
    %15 = vector.load %arg5[%c0_9, %c0_10] : memref<128x128xf32, #tpu.memory_space<vmem>>, vector<128x128xf32>
    tpu.vector_store %arg5[%c0_9, %c0_10], %14 {strides = array<i32>} : memref<128x128xf32, #tpu.memory_space<vmem>>, vector<128x128xf32>,
    return
  }
  func.func @transform_0(%arg0: i32) -> (i32, i32) {
    %c0_i32 = arith.constant 0 : i32
    %c0_i32_0 = arith.constant 0 : i32
    return %arg0, %c0_i32 : i32, i32
  }
  func.func @transform_1(%arg0: i32) -> (i32, i32) {
    %c0_i32 = arith.constant 0 : i32
    %c0_i32_0 = arith.constant 0 : i32
    %c0_i32_1 = arith.constant 0 : i32
    return %c0_i32, %c0_i32_0 : i32, i32
  }
  func.func @transform_2(%arg0: i32) -> (i32, i32) {
    %c0_i32 = arith.constant 0 : i32
    %c0_i32_0 = arith.constant 0 : i32
    %c0_i32_1 = arith.constant 0 : i32
    return %c0_i32, %c0_i32_0 : i32, i32
  }
  func.func @transform_3(%arg0: i32) -> (i32, i32) {
    %c0_i32 = arith.constant 0 : i32
    %c0_i32_0 = arith.constant 0 : i32
    %c0_i32_1 = arith.constant 0 : i32
    return %c0_i32, %c0_i32_0 : i32, i32
  }
  func.func @transform_4(%arg0: i32) -> (i32, i32) {
    %c0_i32 = arith.constant 0 : i32
    %c0_i32_0 = arith.constant 0 : i32
    return %arg0, %c0_i32 : i32, i32
  }
}

</mosaic_0001>

<bundles_post_ra>
// kernel: tpu_custom_call.1
= control target key start
LH: loop header
LB: loop body
LE: loop exit
PB: predicated region body
PF: predicated region fallthrough
CT: control target
= control target key end

     0   :  { %9 = vsyncpa [#allocation3], 0  ;;  %s1925_s0 = inlined_call_operand.hbm [shape: f32[128,1152], index: 0, kind: input, shape index: {}]   ;;  %s1926_s1 = inlined_call_operand.hbm [shape: f32[1152,128], index: 1, kind: input, shape index: {}]   ;;  %s1927_s2 = inlined_call_operand.vmem [shape: f32[1,128], index: 2, kind: input, shape index: {}]   ;;  %s1928_s3 = inlined_call_operand.vmem [shape: f32[1,128], index: 3, kind: input, shape index: {}]   ;;  %s1929_s4 = inlined_call_operand.hbm [shape: f32[128,128], index: 4, kind: output, shape index: {}]  }
   0x1   :  { %10 = vsyncpa [#allocation6], 0 }
   0x2   :  { %11 = vsyncpa [#allocation4], 0  ;;  %s1686_s15 = smov [#allocation2]  }
   0x3   :  { %s17_s16 = sshll.u32 %s1686_s15, 4  ;;  %s18_s16 = int_to_ptr.vmem [resolvable:$true] %s17_s16 }
   0x4   :  { %s1628_s17 = scalar_lea.vmem %s18_s16, 18432  ;;  %p1633_p1 = scmp.lt.s32.totalorder %s18_s16, %s18_s16 }
   0x5   :  { %p1629_p0 = scmp.ne.s32.totalorder %s18_s16, %s1628_s17  ;;  %p1634_p2 = scmp.lt.s32.totalorder %s1628_s17, %s1628_s17 }
   0x7   :  { %p1635_p3 = por %p1634_p2, %p1633_p1 }
   0x9   :  { %p1636_p4 = pnand %p1635_p3, %p1629_p0 }
   0xb   :  { %1639 = shalt.err (!%p1636_p4)
}
   0xc   :  { %s1687_s18 = smov 1152   ;;  %s1688_s19 = smov 72  }
   0xd   :  { %23 = dma.hbm_to_vmem [thread:$0]  %s1925_s0, 18432, %s18_s16, [#allocation3], %s1687_s18, %s1687_s18, %s1688_s19  }
   0xe   :  { %s1689_s22 = smov [#allocation5]  }
   0xf   :  { %s29_s23 = sshll.u32 %s1689_s22, 4  ;;  %s30_s23 = int_to_ptr.vmem [resolvable:$true] %s29_s23 }
  0x10   :  { %s1648_s24 = scalar_lea.vmem %s30_s23, 18432  ;;  %p1653_p6 = scmp.lt.s32.totalorder %s30_s23, %s30_s23 }
  0x11   :  { %p1649_p5 = scmp.ne.s32.totalorder %s30_s23, %s1648_s24  ;;  %p1654_p7 = scmp.lt.s32.totalorder %s1648_s24, %s1648_s24 }
  0x13   :  { %p1655_p8 = por %p1654_p7, %p1653_p6 }
  0x15   :  { %p1656_p9 = pnand %p1655_p8, %p1649_p5 }
  0x17   :  { %1659 = shalt.err (!%p1656_p9)
}
  0x18   :  { %s1690_s25 = smov 128   ;;  %s1691_s26 = smov 8  }
  0x19   :  { %35 = dma.hbm_to_vmem [thread:$0]  %s1926_s1, 18432, %s30_s23, [#allocation6], %s1690_s25, %s1690_s25, %s1691_s26  }
  0x1a   :  { %1680 = dma.done.wait [#allocation3], 18432  }
  0x1b   :  { %1681 = vsyncadd [#allocation3], 4294948864 }
  0x1c   :  { %1682 = dma.done.wait [#allocation6], 18432  }
  0x1d   :  { %1683 = vsyncadd [#allocation6], 4294948864  ;;  %v221_v0 = vld [vmem:[#allocation5 + $0xf8] sm:$0xff]  ;;  %v220_v4 = vld [vmem:[#allocation5 + $0xf0] sm:$0xff] }
  0x1e   :  { %v253_v1 = vld [vmem:[#allocation5 + $0x1f8] sm:$0xff]  ;;  %1173 = vmatprep.subr.mxu0 %v221_v0  ;;  %v252_v5 = vld [vmem:[#allocation5 + $0x1f0] sm:$0xff]  ;;  %v219_v8 = vld [vmem:[#allocation5 + $0xe8] sm:$0xff] }
  0x1f   :  { %v205_v2 = vld [vmem:[#allocation5 + $0x78] sm:$0xff]  ;;  %1253 = vmatprep.subr.mxu1 %v253_v1  ;;  %v204_v6 = vld [vmem:[#allocation5 + $0x70] sm:$0xff]  ;;  %v251_v9 = vld [vmem:[#allocation5 + $0x1e8] sm:$0xff] }
  0x20   :  { %v237_v3 = vld [vmem:[#allocation5 + $0x178] sm:$0xff]  ;;  %1174 = vmatpush3.msra.mxu0 %v205_v2  ;;  %v236_v7 = vld [vmem:[#allocation5 + $0x170] sm:$0xff]  ;;  %v203_v10 = vld [vmem:[#allocation5 + $0x68] sm:$0xff] }
  0x21   :  { %1254 = vmatpush3.msra.mxu1 %v237_v3  ;;  %1175 = vmatprep.subr.mxu0 %v220_v4  ;;  %v235_v11 = vld [vmem:[#allocation5 + $0x168] sm:$0xff]  ;;  %v218_v12 = vld [vmem:[#allocation5 + $0xe0] sm:$0xff]  ;;  %v217_v16 = vld [vmem:[#allocation5 + $0xd8] sm:$0xff] }
  0x22   :  { %1255 = vmatprep.subr.mxu1 %v252_v5  ;;  %1176 = vmatpush3.msra.mxu0 %v204_v6  ;;  %v250_v13 = vld [vmem:[#allocation5 + $0x1e0] sm:$0xff]  ;;  %v249_v17 = vld [vmem:[#allocation5 + $0x1d8] sm:$0xff]  ;;  %v216_v20 = vld [vmem:[#allocation5 + $0xd0] sm:$0xff] }
  0x23   :  { %1256 = vmatpush3.msra.mxu1 %v236_v7  ;;  %1177 = vmatprep.subr.mxu0 %v219_v8  ;;  %v202_v14 = vld [vmem:[#allocation5 + $0x60] sm:$0xff]  ;;  %v201_v18 = vld [vmem:[#allocation5 + $0x58] sm:$0xff]  ;;  %v248_v21 = vld [vmem:[#allocation5 + $0x1d0] sm:$0xff] }
  0x24   :  { %1257 = vmatprep.subr.mxu1 %v251_v9  ;;  %v234_v15 = vld [vmem:[#allocation5 + $0x160] sm:$0xff]  ;;  %1178 = vmatpush3.msra.mxu0 %v203_v10  ;;  %v233_v19 = vld [vmem:[#allocation5 + $0x158] sm:$0xff]  ;;  %v200_v22 = vld [vmem:[#allocation5 + $0x50] sm:$0xff] }
  0x25   :  { %1258 = vmatpush3.msra.mxu1 %v235_v11  ;;  %1179 = vmatprep.subr.mxu0 %v218_v12  ;;  %v232_v23 = vld [vmem:[#allocation5 + $0x150] sm:$0xff]  ;;  %v215_v24 = vld [vmem:[#allocation5 + $0xc8] sm:$0xff]  ;;  %v214_v28 = vld [vmem:[#allocation5 + $0xc0] sm:$0xff] }
  0x26   :  { %1259 = vmatprep.subr.mxu1 %v250_v13  ;;  %1180 = vmatpush3.msra.mxu0 %v202_v14  ;;  %v247_v25 = vld [vmem:[#allocation5 + $0x1c8] sm:$0xff]  ;;  %v246_v29 = vld [vmem:[#allocation5 + $0x1c0] sm:$0xff]  ;;  %v213_v32 = vld [vmem:[#allocation5 + $0xb8] sm:$0xff] }
  0x27   :  { %1260 = vmatpush3.msra.mxu1 %v234_v15  ;;  %1181 = vmatprep.subr.mxu0 %v217_v16  ;;  %v199_v26 = vld [vmem:[#allocation5 + $0x48] sm:$0xff]  ;;  %v198_v30 = vld [vmem:[#allocation5 + $0x40] sm:$0xff]  ;;  %v245_v33 = vld [vmem:[#allocation5 + $0x1b8] sm:$0xff] }
  0x28   :  { %1261 = vmatprep.subr.mxu1 %v249_v17  ;;  %1182 = vmatpush3.msra.mxu0 %v201_v18  ;;  %v231_v27 = vld [vmem:[#allocation5 + $0x148] sm:$0xff]  ;;  %v230_v31 = vld [vmem:[#allocation5 + $0x140] sm:$0xff]  ;;  %v197_v34 = vld [vmem:[#allocation5 + $0x38] sm:$0xff] }
  0x29   :  { %1262 = vmatpush3.msra.mxu1 %v233_v19  ;;  %1183 = vmatprep.subr.mxu0 %v216_v20  ;;  %v229_v35 = vld [vmem:[#allocation5 + $0x138] sm:$0xff]  ;;  %v212_v36 = vld [vmem:[#allocation5 + $0xb0] sm:$0xff]  ;;  %v211_v40 = vld [vmem:[#allocation5 + $0xa8] sm:$0xff] }
  0x2a   :  { %1263 = vmatprep.subr.mxu1 %v248_v21  ;;  %1184 = vmatpush3.msra.mxu0 %v200_v22  ;;  %v244_v37 = vld [vmem:[#allocation5 + $0x1b0] sm:$0xff]  ;;  %v243_v41 = vld [vmem:[#allocation5 + $0x1a8] sm:$0xff]  ;;  %v210_v44 = vld [vmem:[#allocation5 + $0xa0] sm:$0xff] }
  0x2b   :  { %1264 = vmatpush3.msra.mxu1 %v232_v23  ;;  %1185 = vmatprep.subr.mxu0 %v215_v24  ;;  %v196_v38 = vld [vmem:[#allocation5 + $0x30] sm:$0xff]  ;;  %v195_v42 = vld [vmem:[#allocation5 + $0x28] sm:$0xff]  ;;  %v242_v45 = vld [vmem:[#allocation5 + $0x1a0] sm:$0xff] }
  0x2c   :  { %1265 = vmatprep.subr.mxu1 %v247_v25  ;;  %1186 = vmatpush3.msra.mxu0 %v199_v26  ;;  %v228_v39 = vld [vmem:[#allocation5 + $0x130] sm:$0xff]  ;;  %v227_v43 = vld [vmem:[#allocation5 + $0x128] sm:$0xff]  ;;  %v194_v46 = vld [vmem:[#allocation5 + $0x20] sm:$0xff] }
  0x2d   :  { %1266 = vmatpush3.msra.mxu1 %v231_v27  ;;  %1187 = vmatprep.subr.mxu0 %v214_v28  ;;  %v226_v47 = vld [vmem:[#allocation5 + $0x120] sm:$0xff]  ;;  %v209_v48 = vld [vmem:[#allocation5 + $0x98] sm:$0xff]  ;;  %v208_v52 = vld [vmem:[#allocation5 + $0x90] sm:$0xff] }
  0x2e   :  { %1267 = vmatprep.subr.mxu1 %v246_v29  ;;  %1188 = vmatpush3.msra.mxu0 %v198_v30  ;;  %v241_v49 = vld [vmem:[#allocation5 + $0x198] sm:$0xff]  ;;  %v240_v53 = vld [vmem:[#allocation5 + $0x190] sm:$0xff]  ;;  %v207_v56 = vld [vmem:[#allocation5 + $0x88] sm:$0xff] }
  0x2f   :  { %1268 = vmatpush3.msra.mxu1 %v230_v31  ;;  %1189 = vmatprep.subr.mxu0 %v213_v32  ;;  %v193_v50 = vld [vmem:[#allocation5 + $0x18] sm:$0xff]  ;;  %v192_v54 = vld [vmem:[#allocation5 + $0x10] sm:$0xff]  ;;  %v239_v57 = vld [vmem:[#allocation5 + $0x188] sm:$0xff] }
  0x30   :  { %1269 = vmatprep.subr.mxu1 %v245_v33  ;;  %1190 = vmatpush3.msra.mxu0 %v197_v34  ;;  %v225_v51 = vld [vmem:[#allocation5 + $0x118] sm:$0xff]  ;;  %v224_v55 = vld [vmem:[#allocation5 + $0x110] sm:$0xff]  ;;  %v191_v58 = vld [vmem:[#allocation5 + $0x8] sm:$0xff] }
  0x31   :  { %1270 = vmatpush3.msra.mxu1 %v229_v35  ;;  %1191 = vmatprep.subr.mxu0 %v212_v36  ;;  %v223_v59 = vld [vmem:[#allocation5 + $0x108] sm:$0xff]  ;;  %v206_v60 = vld [vmem:[#allocation5 + $0x80] sm:$0xff]  ;;  %v49_v1 = vld [vmem:[#allocation2 + $0x18] sm:$0xff] }
  0x32   :  { %1271 = vmatprep.subr.mxu1 %v244_v37  ;;  %1192 = vmatpush3.msra.mxu0 %v196_v38  ;;  %v238_v61 = vld [vmem:[#allocation5 + $0x180] sm:$0xff]  ;;  %v47_v63 = vld [vmem:[#allocation2 + $0x8] sm:$0xff]  ;;  %v48_v3 = vld [vmem:[#allocation2 + $0x10] sm:$0xff] }
  0x33   :  { %1272 = vmatpush3.msra.mxu1 %v228_v39  ;;  %1193 = vmatprep.subr.mxu0 %v211_v40  ;;  %v190_v62 = vld [vmem:[#allocation5] sm:$0xff]  ;;  %v285_v4 = vld [vmem:[#allocation5 + $0x2f8] sm:$0xff]  ;;  %v56_v8 = vld [vmem:[#allocation2 + $0x50] sm:$0xff] }
  0x34   :  { %1273 = vmatprep.subr.mxu1 %v243_v41  ;;  %1194 = vmatpush3.msra.mxu0 %v195_v42  ;;  %v222_v0 = vld [vmem:[#allocation5 + $0x100] sm:$0xff]  ;;  %v317_v5 = vld [vmem:[#allocation5 + $0x3f8] sm:$0xff]  ;;  %v55_v10 = vld [vmem:[#allocation2 + $0x48] sm:$0xff] }
  0x35   :  { %1274 = vmatpush3.msra.mxu1 %v227_v43  ;;  %1195 = vmatprep.subr.mxu0 %v210_v44  ;;  %v46_v2 = vld [vmem:[#allocation2] sm:$0xff]  ;;  %v269_v6 = vld [vmem:[#allocation5 + $0x278] sm:$0xff]  ;;  %v284_v12 = vld [vmem:[#allocation5 + $0x2f0] sm:$0xff] }
  0x36   :  { %1275 = vmatprep.subr.mxu1 %v242_v45  ;;  %1196 = vmatpush3.msra.mxu0 %v194_v46  ;;  %v301_v7 = vld [vmem:[#allocation5 + $0x378] sm:$0xff]  ;;  %v58_v9 = vld [vmem:[#allocation2 + $0x60] sm:$0xff]  ;;  %v316_v13 = vld [vmem:[#allocation5 + $0x3f0] sm:$0xff] }
  0x37   :  { %1276 = vmatpush3.msra.mxu1 %v226_v47  ;;  %1197 = vmatprep.subr.mxu0 %v209_v48  ;;  %v57_v11 = vld [vmem:[#allocation2 + $0x58] sm:$0xff]  ;;  %v268_v14 = vld [vmem:[#allocation5 + $0x270] sm:$0xff]  ;;  %v67_v17 = vld [vmem:[#allocation2 + $0xa8] sm:$0xff] }
  0x38   :  { %1277 = vmatprep.subr.mxu1 %v241_v49  ;;  %1198 = vmatpush3.msra.mxu0 %v193_v50  ;;  %v300_v15 = vld [vmem:[#allocation5 + $0x370] sm:$0xff]  ;;  %v65_v16 = vld [vmem:[#allocation2 + $0x98] sm:$0xff]  ;;  %v66_v19 = vld [vmem:[#allocation2 + $0xa0] sm:$0xff] }
  0x39   :  { %1278 = vmatpush3.msra.mxu1 %v225_v51  ;;  %1199 = vmatprep.subr.mxu0 %v208_v52  ;;  %v64_v18 = vld [vmem:[#allocation2 + $0x90] sm:$0xff]  ;;  %v283_v20 = vld [vmem:[#allocation5 + $0x2e8] sm:$0xff]  ;;  %v74_v24 = vld [vmem:[#allocation2 + $0xe0] sm:$0xff] }
  0x3a   :  { %1279 = vmatprep.subr.mxu1 %v240_v53  ;;  %1200 = vmatpush3.msra.mxu0 %v192_v54  ;;  %v315_v21 = vld [vmem:[#allocation5 + $0x3e8] sm:$0xff]  ;;  %v76_v25 = vld [vmem:[#allocation2 + $0xf0] sm:$0xff]  ;;  %v73_v26 = vld [vmem:[#allocation2 + $0xd8] sm:$0xff] }
  0x3b   :  { %1280 = vmatpush3.msra.mxu1 %v224_v55  ;;  %1201 = vmatprep.subr.mxu0 %v207_v56  ;;  %v267_v22 = vld [vmem:[#allocation5 + $0x268] sm:$0xff]  ;;  %v282_v28 = vld [vmem:[#allocation5 + $0x2e0] sm:$0xff]  ;;  %v85_v33 = vld [vmem:[#allocation2 + $0x138] sm:$0xff] }
  0x3c   :  { %1281 = vmatprep.subr.mxu1 %v239_v57  ;;  %1202 = vmatpush3.msra.mxu0 %v191_v58  ;;  %v299_v23 = vld [vmem:[#allocation5 + $0x368] sm:$0xff]  ;;  %v314_v29 = vld [vmem:[#allocation5 + $0x3e0] sm:$0xff]  ;;  %v84_v35 = vld [vmem:[#allocation2 + $0x130] sm:$0xff] }
  0x3d   :  { %1282 = vmatpush3.msra.mxu1 %v223_v59  ;;  %1203 = vmatprep.subr.mxu0 %v206_v60  ;;  %v75_v27 = vld [vmem:[#allocation2 + $0xe8] sm:$0xff]  ;;  %v266_v30 = vld [vmem:[#allocation5 + $0x260] sm:$0xff]  ;;  %v281_v36 = vld [vmem:[#allocation5 + $0x2d8] sm:$0xff] }
  0x3e   :  { %1283 = vmatprep.subr.mxu1 %v238_v61  ;;  %1204 = vmatpush3.msra.mxu0 %v190_v62  ;;  %v298_v31 = vld [vmem:[#allocation5 + $0x360] sm:$0xff]  ;;  %v83_v32 = vld [vmem:[#allocation2 + $0x128] sm:$0xff]  ;;  %v313_v37 = vld [vmem:[#allocation5 + $0x3d8] sm:$0xff] }
  0x3f   :  { %405 = vmatprep.mubr.f32.mxu0 %v47_v63  ;;  %1284 = vmatpush3.msra.mxu1 %v222_v0  ;;  %v82_v34 = vld [vmem:[#allocation2 + $0x120] sm:$0xff]  ;;  %v265_v38 = vld [vmem:[#allocation5 + $0x258] sm:$0xff]  ;;  %v92_v40 = vld [vmem:[#allocation2 + $0x170] sm:$0xff] }
  0x40   :  { %550 = vmatprep.mubr.f32.mxu1 %v49_v1  ;;  %406 = vmatmul.mubr.f32.vlgmr.msra.gmra.mxu0 %v46_v2  ;;  %v297_v39 = vld [vmem:[#allocation5 + $0x358] sm:$0xff]  ;;  %v94_v41 = vld [vmem:[#allocation2 + $0x180] sm:$0xff]  ;;  %v91_v42 = vld [vmem:[#allocation2 + $0x168] sm:$0xff] }
  0x41   :  { %551 = vmatmul.mubr.f32.vlgmr.msra.gmra.mxu1 %v48_v3  ;;  %1333 = vmatprep.subr.mxu0 %v285_v4  ;;  %v93_v43 = vld [vmem:[#allocation2 + $0x178] sm:$0xff]  ;;  %v280_v44 = vld [vmem:[#allocation5 + $0x2d0] sm:$0xff]  ;;  %v103_v49 = vld [vmem:[#allocation2 + $0x1c8] sm:$0xff] }
  0x42   :  { %1413 = vmatprep.subr.mxu1 %v317_v5  ;;  %1334 = vmatpush3.msra.mxu0 %v269_v6  ;;  %v312_v45 = vld [vmem:[#allocation5 + $0x3d0] sm:$0xff]  ;;  %v101_v48 = vld [vmem:[#allocation2 + $0x1b8] sm:$0xff]  ;;  %v102_v51 = vld [vmem:[#allocation2 + $0x1c0] sm:$0xff] }
  0x43   :  { %1414 = vmatpush3.msra.mxu1 %v301_v7  ;;  %410 = vmatprep.mubr.f32.mxu0 %v56_v8  ;;  %v264_v46 = vld [vmem:[#allocation5 + $0x250] sm:$0xff]  ;;  %v279_v52 = vld [vmem:[#allocation5 + $0x2c8] sm:$0xff]  ;;  %v110_v56 = vld [vmem:[#allocation2 + $0x200] sm:$0xff] }
  0x44   :  { %555 = vmatprep.mubr.f32.mxu1 %v58_v9  ;;  %411 = vmatmul.mubr.f32.gmra.mxu0 %v55_v10  ;;  %v296_v47 = vld [vmem:[#allocation5 + $0x350] sm:$0xff]  ;;  %v311_v53 = vld [vmem:[#allocation5 + $0x3c8] sm:$0xff]  ;;  %v109_v58 = vld [vmem:[#allocation2 + $0x1f8] sm:$0xff] }
  0x45   :  { %556 = vmatmul.mubr.f32.gmra.mxu1 %v57_v11  ;;  %1335 = vmatprep.subr.mxu0 %v284_v12  ;;  %v100_v50 = vld [vmem:[#allocation2 + $0x1b0] sm:$0xff]  ;;  %v263_v54 = vld [vmem:[#allocation5 + $0x248] sm:$0xff]  ;;  %v278_v60 = vld [vmem:[#allocation5 + $0x2c0] sm:$0xff] }
  0x46   :  { %1415 = vmatprep.subr.mxu1 %v316_v13  ;;  %1336 = vmatpush3.msra.mxu0 %v268_v14  ;;  %v295_v55 = vld [vmem:[#allocation5 + $0x348] sm:$0xff]  ;;  %v112_v57 = vld [vmem:[#allocation2 + $0x210] sm:$0xff]  ;;  %v310_v61 = vld [vmem:[#allocation5 + $0x3c0] sm:$0xff] }
  0x47   :  { %1416 = vmatpush3.msra.mxu1 %v300_v15  ;;  %415 = vmatprep.mubr.f32.mxu0 %v65_v16  ;;  %v111_v59 = vld [vmem:[#allocation2 + $0x208] sm:$0xff]  ;;  %v262_v62 = vld [vmem:[#allocation5 + $0x240] sm:$0xff]  ;;  %v121_v1 = vld [vmem:[#allocation2 + $0x258] sm:$0xff] }
  0x48   :  { %560 = vmatprep.mubr.f32.mxu1 %v67_v17  ;;  %416 = vmatmul.mubr.f32.gmra.mxu0 %v64_v18  ;;  %v294_v63 = vld [vmem:[#allocation5 + $0x340] sm:$0xff]  ;;  %v119_v0 = vld [vmem:[#allocation2 + $0x248] sm:$0xff]  ;;  %v120_v3 = vld [vmem:[#allocation2 + $0x250] sm:$0xff] }
  0x49   :  { %561 = vmatmul.mubr.f32.gmra.mxu1 %v66_v19  ;;  %1337 = vmatprep.subr.mxu0 %v283_v20  ;;  %v118_v2 = vld [vmem:[#allocation2 + $0x240] sm:$0xff]  ;;  %v277_v4 = vld [vmem:[#allocation5 + $0x2b8] sm:$0xff]  ;;  %v128_v8 = vld [vmem:[#allocation2 + $0x290] sm:$0xff] }
  0x4a   :  { %1417 = vmatprep.subr.mxu1 %v315_v21  ;;  %1338 = vmatpush3.msra.mxu0 %v267_v22  ;;  %v309_v5 = vld [vmem:[#allocation5 + $0x3b8] sm:$0xff]  ;;  %v130_v9 = vld [vmem:[#allocation2 + $0x2a0] sm:$0xff]  ;;  %v127_v10 = vld [vmem:[#allocation2 + $0x288] sm:$0xff] }
  0x4b   :  { %1418 = vmatpush3.msra.mxu1 %v299_v23  ;;  %420 = vmatprep.mubr.f32.mxu0 %v74_v24  ;;  %v261_v6 = vld [vmem:[#allocation5 + $0x238] sm:$0xff]  ;;  %v276_v12 = vld [vmem:[#allocation5 + $0x2b0] sm:$0xff]  ;;  %v139_v17 = vld [vmem:[#allocation2 + $0x2e8] sm:$0xff] }
  0x4c   :  { %565 = vmatprep.mubr.f32.mxu1 %v76_v25  ;;  %421 = vmatmul.mubr.f32.gmra.mxu0 %v73_v26  ;;  %v293_v7 = vld [vmem:[#allocation5 + $0x338] sm:$0xff]  ;;  %v308_v13 = vld [vmem:[#allocation5 + $0x3b0] sm:$0xff]  ;;  %v138_v19 = vld [vmem:[#allocation2 + $0x2e0] sm:$0xff] }
  0x4d   :  { %566 = vmatmul.mubr.f32.gmra.mxu1 %v75_v27  ;;  %1339 = vmatprep.subr.mxu0 %v282_v28  ;;  %v129_v11 = vld [vmem:[#allocation2 + $0x298] sm:$0xff]  ;;  %v260_v14 = vld [vmem:[#allocation5 + $0x230] sm:$0xff]  ;;  %v275_v20 = vld [vmem:[#allocation5 + $0x2a8] sm:$0xff] }
  0x4e   :  { %1419 = vmatprep.subr.mxu1 %v314_v29  ;;  %1340 = vmatpush3.msra.mxu0 %v266_v30  ;;  %v292_v15 = vld [vmem:[#allocation5 + $0x330] sm:$0xff]  ;;  %v137_v16 = vld [vmem:[#allocation2 + $0x2d8] sm:$0xff]  ;;  %v307_v21 = vld [vmem:[#allocation5 + $0x3a8] sm:$0xff] }
  0x4f   :  { %1420 = vmatpush3.msra.mxu1 %v298_v31  ;;  %425 = vmatprep.mubr.f32.mxu0 %v83_v32  ;;  %v136_v18 = vld [vmem:[#allocation2 + $0x2d0] sm:$0xff]  ;;  %v259_v22 = vld [vmem:[#allocation5 + $0x228] sm:$0xff]  ;;  %v146_v24 = vld [vmem:[#allocation2 + $0x320] sm:$0xff] }
  0x50   :  { %570 = vmatprep.mubr.f32.mxu1 %v85_v33  ;;  %426 = vmatmul.mubr.f32.gmra.mxu0 %v82_v34  ;;  %v291_v23 = vld [vmem:[#allocation5 + $0x328] sm:$0xff]  ;;  %v148_v25 = vld [vmem:[#allocation2 + $0x330] sm:$0xff]  ;;  %v145_v26 = vld [vmem:[#allocation2 + $0x318] sm:$0xff] }
  0x51   :  { %571 = vmatmul.mubr.f32.gmra.mxu1 %v84_v35  ;;  %1341 = vmatprep.subr.mxu0 %v281_v36  ;;  %v147_v27 = vld [vmem:[#allocation2 + $0x328] sm:$0xff]  ;;  %v274_v28 = vld [vmem:[#allocation5 + $0x2a0] sm:$0xff]  ;;  %v157_v33 = vld [vmem:[#allocation2 + $0x378] sm:$0xff] }
  0x52   :  { %1421 = vmatprep.subr.mxu1 %v313_v37  ;;  %1342 = vmatpush3.msra.mxu0 %v265_v38  ;;  %v306_v29 = vld [vmem:[#allocation5 + $0x3a0] sm:$0xff]  ;;  %v155_v32 = vld [vmem:[#allocation2 + $0x368] sm:$0xff]  ;;  %v156_v35 = vld [vmem:[#allocation2 + $0x370] sm:$0xff] }
  0x53   :  { %1422 = vmatpush3.msra.mxu1 %v297_v39  ;;  %430 = vmatprep.mubr.f32.mxu0 %v92_v40  ;;  %v258_v30 = vld [vmem:[#allocation5 + $0x220] sm:$0xff]  ;;  %v273_v36 = vld [vmem:[#allocation5 + $0x298] sm:$0xff]  ;;  %v164_v40 = vld [vmem:[#allocation2 + $0x3b0] sm:$0xff] }
  0x54   :  { %575 = vmatprep.mubr.f32.mxu1 %v94_v41  ;;  %431 = vmatmul.mubr.f32.gmra.mxu0 %v91_v42  ;;  %v290_v31 = vld [vmem:[#allocation5 + $0x320] sm:$0xff]  ;;  %v305_v37 = vld [vmem:[#allocation5 + $0x398] sm:$0xff]  ;;  %v163_v42 = vld [vmem:[#allocation2 + $0x3a8] sm:$0xff] }
  0x55   :  { %576 = vmatmul.mubr.f32.gmra.mxu1 %v93_v43  ;;  %1343 = vmatprep.subr.mxu0 %v280_v44  ;;  %v154_v34 = vld [vmem:[#allocation2 + $0x360] sm:$0xff]  ;;  %v257_v38 = vld [vmem:[#allocation5 + $0x218] sm:$0xff]  ;;  %v272_v44 = vld [vmem:[#allocation5 + $0x290] sm:$0xff] }
  0x56   :  { %1423 = vmatprep.subr.mxu1 %v312_v45  ;;  %1344 = vmatpush3.msra.mxu0 %v264_v46  ;;  %v289_v39 = vld [vmem:[#allocation5 + $0x318] sm:$0xff]  ;;  %v166_v41 = vld [vmem:[#allocation2 + $0x3c0] sm:$0xff]  ;;  %v304_v45 = vld [vmem:[#allocation5 + $0x390] sm:$0xff] }
  0x57   :  { %1424 = vmatpush3.msra.mxu1 %v296_v47  ;;  %435 = vmatprep.mubr.f32.mxu0 %v101_v48  ;;  %v165_v43 = vld [vmem:[#allocation2 + $0x3b8] sm:$0xff]  ;;  %v256_v46 = vld [vmem:[#allocation5 + $0x210] sm:$0xff] }
  0x58   :  { %580 = vmatprep.mubr.f32.mxu1 %v103_v49  ;;  %436 = vmatmul.mubr.f32.gmra.mxu0 %v100_v50  ;;  %v288_v47 = vld [vmem:[#allocation5 + $0x310] sm:$0xff]  ;;  %v173_v48 = vld [vmem:[#allocation2 + $0x3f8] sm:$0xff]  ;;  %v175_v49 = vld [vmem:[#allocation2 + $0x408] sm:$0xff] }
  0x59   :  { %581 = vmatmul.mubr.f32.gmra.mxu1 %v102_v51  ;;  %1345 = vmatprep.subr.mxu0 %v279_v52  ;;  %v172_v50 = vld [vmem:[#allocation2 + $0x3f0] sm:$0xff]  ;;  %v174_v51 = vld [vmem:[#allocation2 + $0x400] sm:$0xff]  ;;  %v271_v52 = vld [vmem:[#allocation5 + $0x288] sm:$0xff] }
  0x5a   :  { %1425 = vmatprep.subr.mxu1 %v311_v53  ;;  %1346 = vmatpush3.msra.mxu0 %v263_v54  ;;  %v303_v53 = vld [vmem:[#allocation5 + $0x388] sm:$0xff] }
  0x5b   :  { %1426 = vmatpush3.msra.mxu1 %v295_v55  ;;  %440 = vmatprep.mubr.f32.mxu0 %v110_v56  ;;  %v255_v54 = vld [vmem:[#allocation5 + $0x208] sm:$0xff]  ;;  %v182_v56 = vld [vmem:[#allocation2 + $0x440] sm:$0xff] }
  0x5c   :  { %585 = vmatprep.mubr.f32.mxu1 %v112_v57  ;;  %441 = vmatmul.mubr.f32.gmra.mxu0 %v109_v58  ;;  %v287_v55 = vld [vmem:[#allocation5 + $0x308] sm:$0xff]  ;;  %v184_v57 = vld [vmem:[#allocation2 + $0x450] sm:$0xff]  ;;  %v181_v58 = vld [vmem:[#allocation2 + $0x438] sm:$0xff] }
  0x5d   :  { %586 = vmatmul.mubr.f32.gmra.mxu1 %v111_v59  ;;  %1347 = vmatprep.subr.mxu0 %v278_v60  ;;  %v183_v59 = vld [vmem:[#allocation2 + $0x448] sm:$0xff]  ;;  %v270_v60 = vld [vmem:[#allocation5 + $0x280] sm:$0xff] }
  0x5e   :  { %1427 = vmatprep.subr.mxu1 %v310_v61  ;;  %1348 = vmatpush3.msra.mxu0 %v262_v62  ;;  %v302_v61 = vld [vmem:[#allocation5 + $0x380] sm:$0xff] }
  0x5f   :  { %1428 = vmatpush3.msra.mxu1 %v294_v63  ;;  %445 = vmatprep.mubr.f32.mxu0 %v119_v0  ;;  %v254_v62 = vld [vmem:[#allocation5 + $0x200] sm:$0xff]  ;;  %v51_v0 = vld [vmem:[#allocation2 + $0x28] sm:$0xff] }
  0x60   :  { %590 = vmatprep.mubr.f32.mxu1 %v121_v1  ;;  %446 = vmatmul.mubr.f32.gmra.mxu0 %v118_v2  ;;  %v286_v63 = vld [vmem:[#allocation5 + $0x300] sm:$0xff]  ;;  %v53_v1 = vld [vmem:[#allocation2 + $0x38] sm:$0xff] }
  0x61   :  { %591 = vmatmul.mubr.f32.gmra.mxu1 %v120_v3  ;;  %1349 = vmatprep.subr.mxu0 %v277_v4  ;;  %v50_v2 = vld [vmem:[#allocation2 + $0x20] sm:$0xff]  ;;  %v52_v3 = vld [vmem:[#allocation2 + $0x30] sm:$0xff]  ;;  %v333_v4 = vld [vmem:[#allocation5 + $0x478] sm:$0xff] }
  0x62   :  { %1429 = vmatprep.subr.mxu1 %v309_v5  ;;  %1350 = vmatpush3.msra.mxu0 %v261_v6  ;;  %v60_v5 = vld [vmem:[#allocation2 + $0x70] sm:$0xff]  ;;  %v62_v6 = vld [vmem:[#allocation2 + $0x80] sm:$0xff] }
  0x63   :  { %1430 = vmatpush3.msra.mxu1 %v293_v7  ;;  %450 = vmatprep.mubr.f32.mxu0 %v128_v8  ;;  %v59_v7 = vld [vmem:[#allocation2 + $0x68] sm:$0xff]  ;;  %v61_v8 = vld [vmem:[#allocation2 + $0x78] sm:$0xff] }
  0x64   :  { %595 = vmatprep.mubr.f32.mxu1 %v130_v9  ;;  %451 = vmatmul.mubr.f32.gmra.mxu0 %v127_v10  ;;  %v332_v9 = vld [vmem:[#allocation5 + $0x470] sm:$0xff]  ;;  %v69_v10 = vld [vmem:[#allocation2 + $0xb8] sm:$0xff] }
  0x65   :  { %596 = vmatmul.mubr.f32.gmra.mxu1 %v129_v11  ;;  %1351 = vmatprep.subr.mxu0 %v276_v12  ;;  %v71_v11 = vld [vmem:[#allocation2 + $0xc8] sm:$0xff]  ;;  %v68_v12 = vld [vmem:[#allocation2 + $0xb0] sm:$0xff] }
  0x66   :  { %1431 = vmatprep.subr.mxu1 %v308_v13  ;;  %1352 = vmatpush3.msra.mxu0 %v260_v14  ;;  %v70_v13 = vld [vmem:[#allocation2 + $0xc0] sm:$0xff]  ;;  %v331_v14 = vld [vmem:[#allocation5 + $0x468] sm:$0xff] }
  0x67   :  { %1432 = vmatpush3.msra.mxu1 %v292_v15  ;;  %455 = vmatprep.mubr.f32.mxu0 %v137_v16  ;;  %v78_v15 = vld [vmem:[#allocation2 + $0x100] sm:$0xff]  ;;  %v80_v16 = vld [vmem:[#allocation2 + $0x110] sm:$0xff] }
  0x68   :  { %600 = vmatprep.mubr.f32.mxu1 %v139_v17  ;;  %456 = vmatmul.mubr.f32.gmra.mxu0 %v136_v18  ;;  %v77_v17 = vld [vmem:[#allocation2 + $0xf8] sm:$0xff]  ;;  %v79_v18 = vld [vmem:[#allocation2 + $0x108] sm:$0xff] }
  0x69   :  { %601 = vmatmul.mubr.f32.gmra.mxu1 %v138_v19  ;;  %1353 = vmatprep.subr.mxu0 %v275_v20  ;;  %v330_v19 = vld [vmem:[#allocation5 + $0x460] sm:$0xff]  ;;  %v87_v20 = vld [vmem:[#allocation2 + $0x148] sm:$0xff] }
  0x6a   :  { %1433 = vmatprep.subr.mxu1 %v307_v21  ;;  %1354 = vmatpush3.msra.mxu0 %v259_v22  ;;  %v89_v21 = vld [vmem:[#allocation2 + $0x158] sm:$0xff]  ;;  %v86_v22 = vld [vmem:[#allocation2 + $0x140] sm:$0xff] }
  0x6b   :  { %1434 = vmatpush3.msra.mxu1 %v291_v23  ;;  %460 = vmatprep.mubr.f32.mxu0 %v146_v24  ;;  %v88_v23 = vld [vmem:[#allocation2 + $0x150] sm:$0xff]  ;;  %v329_v24 = vld [vmem:[#allocation5 + $0x458] sm:$0xff] }
  0x6c   :  { %605 = vmatprep.mubr.f32.mxu1 %v148_v25  ;;  %461 = vmatmul.mubr.f32.gmra.mxu0 %v145_v26  ;;  %v96_v25 = vld [vmem:[#allocation2 + $0x190] sm:$0xff]  ;;  %v98_v26 = vld [vmem:[#allocation2 + $0x1a0] sm:$0xff] }
  0x6d   :  { %606 = vmatmul.mubr.f32.gmra.mxu1 %v147_v27  ;;  %1355 = vmatprep.subr.mxu0 %v274_v28  ;;  %v95_v27 = vld [vmem:[#allocation2 + $0x188] sm:$0xff]  ;;  %v97_v28 = vld [vmem:[#allocation2 + $0x198] sm:$0xff] }
  0x6e   :  { %1435 = vmatprep.subr.mxu1 %v306_v29  ;;  %1356 = vmatpush3.msra.mxu0 %v258_v30  ;;  %v328_v29 = vld [vmem:[#allocation5 + $0x450] sm:$0xff]  ;;  %v105_v30 = vld [vmem:[#allocation2 + $0x1d8] sm:$0xff] }
  0x6f   :  { %1436 = vmatpush3.msra.mxu1 %v290_v31  ;;  %465 = vmatprep.mubr.f32.mxu0 %v155_v32  ;;  %v107_v31 = vld [vmem:[#allocation2 + $0x1e8] sm:$0xff]  ;;  %v104_v32 = vld [vmem:[#allocation2 + $0x1d0] sm:$0xff] }
  0x70   :  { %610 = vmatprep.mubr.f32.mxu1 %v157_v33  ;;  %466 = vmatmul.mubr.f32.gmra.mxu0 %v154_v34  ;;  %v106_v33 = vld [vmem:[#allocation2 + $0x1e0] sm:$0xff]  ;;  %v327_v34 = vld [vmem:[#allocation5 + $0x448] sm:$0xff] }
  0x71   :  { %611 = vmatmul.mubr.f32.gmra.mxu1 %v156_v35  ;;  %1357 = vmatprep.subr.mxu0 %v273_v36  ;;  %v114_v35 = vld [vmem:[#allocation2 + $0x220] sm:$0xff]  ;;  %v116_v36 = vld [vmem:[#allocation2 + $0x230] sm:$0xff] }
  0x72   :  { %1437 = vmatprep.subr.mxu1 %v305_v37  ;;  %1358 = vmatpush3.msra.mxu0 %v257_v38  ;;  %v113_v37 = vld [vmem:[#allocation2 + $0x218] sm:$0xff]  ;;  %v115_v38 = vld [vmem:[#allocation2 + $0x228] sm:$0xff] }
  0x73   :  { %1438 = vmatpush3.msra.mxu1 %v289_v39  ;;  %470 = vmatprep.mubr.f32.mxu0 %v164_v40  ;;  %v326_v39 = vld [vmem:[#allocation5 + $0x440] sm:$0xff]  ;;  %v123_v40 = vld [vmem:[#allocation2 + $0x268] sm:$0xff] }
  0x74   :  { %615 = vmatprep.mubr.f32.mxu1 %v166_v41  ;;  %471 = vmatmul.mubr.f32.gmra.mxu0 %v163_v42  ;;  %v125_v41 = vld [vmem:[#allocation2 + $0x278] sm:$0xff]  ;;  %v122_v42 = vld [vmem:[#allocation2 + $0x260] sm:$0xff] }
  0x75   :  { %616 = vmatmul.mubr.f32.gmra.mxu1 %v165_v43  ;;  %1359 = vmatprep.subr.mxu0 %v272_v44  ;;  %v124_v43 = vld [vmem:[#allocation2 + $0x270] sm:$0xff]  ;;  %v325_v44 = vld [vmem:[#allocation5 + $0x438] sm:$0xff] }
  0x76   :  { %1439 = vmatprep.subr.mxu1 %v304_v45  ;;  %1360 = vmatpush3.msra.mxu0 %v256_v46  ;;  %v132_v45 = vld [vmem:[#allocation2 + $0x2b0] sm:$0xff]  ;;  %v134_v46 = vld [vmem:[#allocation2 + $0x2c0] sm:$0xff] }
  0x77   :  { %1440 = vmatpush3.msra.mxu1 %v288_v47  ;;  %475 = vmatprep.mubr.f32.mxu0 %v173_v48  ;;  %v131_v47 = vld [vmem:[#allocation2 + $0x2a8] sm:$0xff]  ;;  %v133_v48 = vld [vmem:[#allocation2 + $0x2b8] sm:$0xff] }
  0x78   :  { %620 = vmatprep.mubr.f32.mxu1 %v175_v49  ;;  %476 = vmatmul.mubr.f32.gmra.mxu0 %v172_v50  ;;  %v324_v49 = vld [vmem:[#allocation5 + $0x430] sm:$0xff]  ;;  %v141_v50 = vld [vmem:[#allocation2 + $0x2f8] sm:$0xff] }
  0x79   :  { %621 = vmatmul.mubr.f32.gmra.mxu1 %v174_v51  ;;  %1361 = vmatprep.subr.mxu0 %v271_v52  ;;  %v143_v51 = vld [vmem:[#allocation2 + $0x308] sm:$0xff]  ;;  %v140_v52 = vld [vmem:[#allocation2 + $0x2f0] sm:$0xff] }
  0x7a   :  { %1441 = vmatprep.subr.mxu1 %v303_v53  ;;  %1362 = vmatpush3.msra.mxu0 %v255_v54  ;;  %v142_v53 = vld [vmem:[#allocation2 + $0x300] sm:$0xff]  ;;  %v323_v54 = vld [vmem:[#allocation5 + $0x428] sm:$0xff] }
  0x7b   :  { %1442 = vmatpush3.msra.mxu1 %v287_v55  ;;  %480 = vmatprep.mubr.f32.mxu0 %v182_v56  ;;  %v150_v55 = vld [vmem:[#allocation2 + $0x340] sm:$0xff]  ;;  %v152_v56 = vld [vmem:[#allocation2 + $0x350] sm:$0xff] }
  0x7c   :  { %625 = vmatprep.mubr.f32.mxu1 %v184_v57  ;;  %481 = vmatmul.mubr.f32.gmra.mxu0 %v181_v58  ;;  %v149_v57 = vld [vmem:[#allocation2 + $0x338] sm:$0xff]  ;;  %v151_v58 = vld [vmem:[#allocation2 + $0x348] sm:$0xff] }
  0x7d   :  { %626 = vmatmul.mubr.f32.gmra.mxu1 %v183_v59  ;;  %1363 = vmatprep.subr.mxu0 %v270_v60  ;;  %v322_v59 = vld [vmem:[#allocation5 + $0x420] sm:$0xff]  ;;  %v159_v60 = vld [vmem:[#allocation2 + $0x388] sm:$0xff] }
  0x7e   :  { %1443 = vmatprep.subr.mxu1 %v302_v61  ;;  %1364 = vmatpush3.msra.mxu0 %v254_v62  ;;  %v161_v61 = vld [vmem:[#allocation2 + $0x398] sm:$0xff]  ;;  %v158_v62 = vld [vmem:[#allocation2 + $0x380] sm:$0xff] }
  0x7f   :  { %1444 = vmatpush3.msra.mxu1 %v286_v63  ;;  %695 = vmatprep.mubr.f32.mxu0 %v51_v0  ;;  %v160_v63 = vld [vmem:[#allocation2 + $0x390] sm:$0xff]  ;;  %v321_v0 = vld [vmem:[#allocation5 + $0x418] sm:$0xff] }
  0x80   :  { %840 = vmatprep.mubr.f32.mxu1 %v53_v1  ;;  %696 = vmatmul.mubr.f32.vlgmr.msra.gmra.mxu0 %v50_v2  ;;  %v168_v1 = vld [vmem:[#allocation2 + $0x3d0] sm:$0xff]  ;;  %v170_v2 = vld [vmem:[#allocation2 + $0x3e0] sm:$0xff] }
  0x81   :  { %841 = vmatmul.mubr.f32.vlgmr.msra.gmra.mxu1 %v52_v3  ;;  %1525 = vmatprep.subr.mxu0 %v333_v4  ;;  %v167_v3 = vld [vmem:[#allocation2 + $0x3c8] sm:$0xff] }
  0x82   :  { %1581 = vmatprep.subr.mxu1 %v333_v4  ;;  %1526 = vmatpush3.msra.mxu0 %v333_v4 }
  0x83   :  { %1597 = vmatpush3.msra.mxu1 %v333_v4  ;;  %700 = vmatprep.mubr.f32.mxu0 %v60_v5  ;;  %v169_v4 = vld [vmem:[#allocation2 + $0x3d8] sm:$0xff]  ;;  %v320_v5 = vld [vmem:[#allocation5 + $0x410] sm:$0xff] }
  0x84   :  { %845 = vmatprep.mubr.f32.mxu1 %v62_v6  ;;  %701 = vmatmul.mubr.f32.gmra.mxu0 %v59_v7  ;;  %v177_v6 = vld [vmem:[#allocation2 + $0x418] sm:$0xff]  ;;  %v179_v7 = vld [vmem:[#allocation2 + $0x428] sm:$0xff] }
  0x85   :  { %846 = vmatmul.mubr.f32.gmra.mxu1 %v61_v8  ;;  %1527 = vmatprep.subr.mxu0 %v332_v9  ;;  %v176_v8 = vld [vmem:[#allocation2 + $0x410] sm:$0xff] }
  0x86   :  { %1582 = vmatprep.subr.mxu1 %v332_v9  ;;  %1528 = vmatpush3.msra.mxu0 %v332_v9 }
  0x87   :  { %1598 = vmatpush3.msra.mxu1 %v332_v9  ;;  %705 = vmatprep.mubr.f32.mxu0 %v69_v10  ;;  %v178_v9 = vld [vmem:[#allocation2 + $0x420] sm:$0xff]  ;;  %v319_v10 = vld [vmem:[#allocation5 + $0x408] sm:$0xff] }
  0x88   :  { %850 = vmatprep.mubr.f32.mxu1 %v71_v11  ;;  %706 = vmatmul.mubr.f32.gmra.mxu0 %v68_v12  ;;  %v186_v11 = vld [vmem:[#allocation2 + $0x460] sm:$0xff]  ;;  %v188_v12 = vld [vmem:[#allocation2 + $0x470] sm:$0xff] }
  0x89   :  { %851 = vmatmul.mubr.f32.gmra.mxu1 %v70_v13  ;;  %1529 = vmatprep.subr.mxu0 %v331_v14  ;;  %v185_v13 = vld [vmem:[#allocation2 + $0x458] sm:$0xff] }
  0x8a   :  { %1583 = vmatprep.subr.mxu1 %v331_v14  ;;  %1530 = vmatpush3.msra.mxu0 %v331_v14 }
  0x8b   :  { %1599 = vmatpush3.msra.mxu1 %v331_v14  ;;  %710 = vmatprep.mubr.f32.mxu0 %v78_v15  ;;  %v187_v14 = vld [vmem:[#allocation2 + $0x468] sm:$0xff]  ;;  %v318_v15 = vld [vmem:[#allocation5 + $0x400] sm:$0xff] }
  0x8c   :  { %855 = vmatprep.mubr.f32.mxu1 %v80_v16  ;;  %711 = vmatmul.mubr.f32.gmra.mxu0 %v77_v17  ;;  %v54_v16 = vld [vmem:[#allocation2 + $0x40] sm:$0xff] }
  0x8d   :  { %856 = vmatmul.mubr.f32.gmra.mxu1 %v79_v18  ;;  %1531 = vmatprep.subr.mxu0 %v330_v19  ;;  %v126_v17 = vld [vmem:[#allocation2 + $0x280] sm:$0xff]  ;;  %v63_v18 = vld [vmem:[#allocation2 + $0x88] sm:$0xff] }
  0x8e   :  { %1584 = vmatprep.subr.mxu1 %v330_v19  ;;  %1532 = vmatpush3.msra.mxu0 %v330_v19 }
  0x8f   :  { %1600 = vmatpush3.msra.mxu1 %v330_v19  ;;  %715 = vmatprep.mubr.f32.mxu0 %v87_v20  ;;  %v135_v19 = vld [vmem:[#allocation2 + $0x2c8] sm:$0xff]  ;;  %v72_v20 = vld [vmem:[#allocation2 + $0xd0] sm:$0xff] }
  0x90   :  { %860 = vmatprep.mubr.f32.mxu1 %v89_v21  ;;  %716 = vmatmul.mubr.f32.gmra.mxu0 %v86_v22  ;;  %v144_v21 = vld [vmem:[#allocation2 + $0x310] sm:$0xff]  ;;  %v81_v22 = vld [vmem:[#allocation2 + $0x118] sm:$0xff] }
  0x91   :  { %861 = vmatmul.mubr.f32.gmra.mxu1 %v88_v23  ;;  %1533 = vmatprep.subr.mxu0 %v329_v24  ;;  %v153_v23 = vld [vmem:[#allocation2 + $0x358] sm:$0xff] }
  0x92   :  { %1585 = vmatprep.subr.mxu1 %v329_v24  ;;  %1534 = vmatpush3.msra.mxu0 %v329_v24 }
  0x93   :  { %1601 = vmatpush3.msra.mxu1 %v329_v24  ;;  %720 = vmatprep.mubr.f32.mxu0 %v96_v25  ;;  %v90_v24 = vld [vmem:[#allocation2 + $0x160] sm:$0xff] }
  0x94   :  { %865 = vmatprep.mubr.f32.mxu1 %v98_v26  ;;  %721 = vmatmul.mubr.f32.gmra.mxu0 %v95_v27  ;;  %v162_v25 = vld [vmem:[#allocation2 + $0x3a0] sm:$0xff]  ;;  %v99_v26 = vld [vmem:[#allocation2 + $0x1a8] sm:$0xff] }
  0x95   :  { %866 = vmatmul.mubr.f32.gmra.mxu1 %v97_v28  ;;  %1535 = vmatprep.subr.mxu0 %v328_v29  ;;  %v171_v27 = vld [vmem:[#allocation2 + $0x3e8] sm:$0xff]  ;;  %v108_v28 = vld [vmem:[#allocation2 + $0x1f0] sm:$0xff] }
  0x96   :  { %1586 = vmatprep.subr.mxu1 %v328_v29  ;;  %1536 = vmatpush3.msra.mxu0 %v328_v29 }
  0x97   :  { %1602 = vmatpush3.msra.mxu1 %v328_v29  ;;  %725 = vmatprep.mubr.f32.mxu0 %v105_v30  ;;  %v180_v29 = vld [vmem:[#allocation2 + $0x430] sm:$0xff]  ;;  %v117_v30 = vld [vmem:[#allocation2 + $0x238] sm:$0xff] }
  0x98   :  { %870 = vmatprep.mubr.f32.mxu1 %v107_v31  ;;  %726 = vmatmul.mubr.f32.gmra.mxu0 %v104_v32  ;;  %v189_v31 = vld [vmem:[#allocation2 + $0x478] sm:$0xff] }
  0x99   :  { %871 = vmatmul.mubr.f32.gmra.mxu1 %v106_v33  ;;  %1537 = vmatprep.subr.mxu0 %v327_v34 }
  0x9a   :  { %1587 = vmatprep.subr.mxu1 %v327_v34  ;;  %1538 = vmatpush3.msra.mxu0 %v327_v34 }
  0x9b   :  { %1603 = vmatpush3.msra.mxu1 %v327_v34  ;;  %730 = vmatprep.mubr.f32.mxu0 %v114_v35  ;;  %v1730_v34 = vld [vmem:[%s1927_s2] ss:$0 sm:$0xff] }
  0x9c   :  { %875 = vmatprep.mubr.f32.mxu1 %v116_v36  ;;  %731 = vmatmul.mubr.f32.gmra.mxu0 %v113_v37 }
  0x9d   :  { %876 = vmatmul.mubr.f32.gmra.mxu1 %v115_v38  ;;  %1539 = vmatprep.subr.mxu0 %v326_v39 }
  0x9e   :  { %1588 = vmatprep.subr.mxu1 %v326_v39  ;;  %1540 = vmatpush3.msra.mxu0 %v326_v39 }
  0x9f   :  { %1604 = vmatpush3.msra.mxu1 %v326_v39  ;;  %735 = vmatprep.mubr.f32.mxu0 %v123_v40 }
  0xa0   :  { %880 = vmatprep.mubr.f32.mxu1 %v125_v41  ;;  %736 = vmatmul.mubr.f32.gmra.mxu0 %v122_v42 }
  0xa1   :  { %881 = vmatmul.mubr.f32.gmra.mxu1 %v124_v43  ;;  %1541 = vmatprep.subr.mxu0 %v325_v44 }
  0xa2   :  { %1589 = vmatprep.subr.mxu1 %v325_v44  ;;  %1542 = vmatpush3.msra.mxu0 %v325_v44 }
  0xa3   :  { %1605 = vmatpush3.msra.mxu1 %v325_v44  ;;  %740 = vmatprep.mubr.f32.mxu0 %v132_v45 }
  0xa4   :  { %885 = vmatprep.mubr.f32.mxu1 %v134_v46  ;;  %741 = vmatmul.mubr.f32.gmra.mxu0 %v131_v47 }
  0xa5   :  { %886 = vmatmul.mubr.f32.gmra.mxu1 %v133_v48  ;;  %1543 = vmatprep.subr.mxu0 %v324_v49 }
  0xa6   :  { %1590 = vmatprep.subr.mxu1 %v324_v49  ;;  %1544 = vmatpush3.msra.mxu0 %v324_v49 }
  0xa7   :  { %1606 = vmatpush3.msra.mxu1 %v324_v49  ;;  %745 = vmatprep.mubr.f32.mxu0 %v141_v50 }
  0xa8   :  { %890 = vmatprep.mubr.f32.mxu1 %v143_v51  ;;  %746 = vmatmul.mubr.f32.gmra.mxu0 %v140_v52 }
  0xa9   :  { %891 = vmatmul.mubr.f32.gmra.mxu1 %v142_v53  ;;  %1545 = vmatprep.subr.mxu0 %v323_v54 }
  0xaa   :  { %1591 = vmatprep.subr.mxu1 %v323_v54  ;;  %1546 = vmatpush3.msra.mxu0 %v323_v54 }
  0xab   :  { %1607 = vmatpush3.msra.mxu1 %v323_v54  ;;  %750 = vmatprep.mubr.f32.mxu0 %v150_v55 }
  0xac   :  { %895 = vmatprep.mubr.f32.mxu1 %v152_v56  ;;  %751 = vmatmul.mubr.f32.gmra.mxu0 %v149_v57 }
  0xad   :  { %896 = vmatmul.mubr.f32.gmra.mxu1 %v151_v58  ;;  %1547 = vmatprep.subr.mxu0 %v322_v59 }
  0xae   :  { %1592 = vmatprep.subr.mxu1 %v322_v59  ;;  %1548 = vmatpush3.msra.mxu0 %v322_v59 }
  0xaf   :  { %1608 = vmatpush3.msra.mxu1 %v322_v59  ;;  %755 = vmatprep.mubr.f32.mxu0 %v159_v60 }
  0xb0   :  { %900 = vmatprep.mubr.f32.mxu1 %v161_v61  ;;  %756 = vmatmul.mubr.f32.gmra.mxu0 %v158_v62 }
  0xb1   :  { %901 = vmatmul.mubr.f32.gmra.mxu1 %v160_v63  ;;  %1549 = vmatprep.subr.mxu0 %v321_v0 }
  0xb2   :  { %1593 = vmatprep.subr.mxu1 %v321_v0  ;;  %1550 = vmatpush3.msra.mxu0 %v321_v0 }
  0xb3   :  { %1609 = vmatpush3.msra.mxu1 %v321_v0  ;;  %760 = vmatprep.mubr.f32.mxu0 %v168_v1 }
  0xb4   :  { %905 = vmatprep.mubr.f32.mxu1 %v170_v2  ;;  %761 = vmatmul.mubr.f32.gmra.mxu0 %v167_v3 }
  0xb5   :  { %906 = vmatmul.mubr.f32.gmra.mxu1 %v169_v4  ;;  %1551 = vmatprep.subr.mxu0 %v320_v5 }
  0xb6   :  { %1594 = vmatprep.subr.mxu1 %v320_v5  ;;  %1552 = vmatpush3.msra.mxu0 %v320_v5 }
  0xb7   :  { %1610 = vmatpush3.msra.mxu1 %v320_v5  ;;  %765 = vmatprep.mubr.f32.mxu0 %v177_v6 }
  0xb8   :  { %910 = vmatprep.mubr.f32.mxu1 %v179_v7  ;;  %766 = vmatmul.mubr.f32.gmra.mxu0 %v176_v8 }
  0xb9   :  { %911 = vmatmul.mubr.f32.gmra.mxu1 %v178_v9  ;;  %1553 = vmatprep.subr.mxu0 %v319_v10 }
  0xba   :  { %1595 = vmatprep.subr.mxu1 %v319_v10  ;;  %1554 = vmatpush3.msra.mxu0 %v319_v10 }
  0xbb   :  { %1611 = vmatpush3.msra.mxu1 %v319_v10  ;;  %770 = vmatprep.mubr.f32.mxu0 %v186_v11 }
  0xbc   :  { %915 = vmatprep.mubr.f32.mxu1 %v188_v12  ;;  %771 = vmatmul.mubr.f32.gmra.mxu0 %v185_v13 }
  0xbd   :  { %916 = vmatmul.mubr.f32.gmra.mxu1 %v187_v14  ;;  %1555 = vmatprep.subr.mxu0 %v318_v15 }
  0xbe   :  { %1596 = vmatprep.subr.mxu1 %v318_v15  ;;  %1556 = vmatpush3.msra.mxu0 %v318_v15 }
  0xbf   :  { %1612 = vmatpush3.msra.mxu1 %v318_v15  ;;  %1557 = vmatprep.mubr.f32.mxu0 %v54_v16 }
  0xc0   :  { %1569 = vmatprep.mubr.f32.mxu1 %v126_v17  ;;  %1558 = vmatmul.mubr.f32.vlgmr.msra.gmra.mxu0 %v63_v18 }
  0xc1   :  { %1570 = vmatmul.mubr.f32.vlgmr.msra.gmra.mxu1 %v135_v19  ;;  %1560 = vmatprep.mubr.f32.mxu0 %v72_v20 }
  0xc2   :  { %1572 = vmatprep.mubr.f32.mxu1 %v144_v21 }
  0xc4   :  { %1561 = vmatmul.mubr.f32.gmra.mxu0 %v81_v22 }
  0xc5   :  { %1573 = vmatmul.mubr.f32.gmra.mxu1 %v153_v23  ;;  %1563 = vmatprep.mubr.f32.mxu0 %v90_v24 }
  0xc6   :  { %1575 = vmatprep.mubr.f32.mxu1 %v162_v25 }
  0xc8   :  { %1564 = vmatmul.mubr.f32.gmra.mxu0 %v99_v26 }
  0xc9   :  { %1576 = vmatmul.mubr.f32.gmra.mxu1 %v171_v27  ;;  %1566 = vmatprep.mubr.f32.mxu0 %v108_v28 }
  0xca   :  { %1578 = vmatprep.mubr.f32.mxu1 %v180_v29 }
  0xcc   :  { %1567 = vmatmul.mubr.f32.gmra.mxu0 %v117_v30 }
  0xcd   :  { %1579 = vmatmul.mubr.f32.gmra.mxu1 %v189_v31 }
 0x100   :  { %v1205_v32 = vpop.f32.mrf.mxu0 }
 0x101   :  { %v1285_v33 = vpop.f32.mrf.mxu1 }
 0x102   :  { %v1206_v35 = vpop.f32.mrf.mxu0 }
 0x103   :  { %v1286_v36 = vpop.f32.mrf.mxu1  ;;  %v1207_v37 = vadd.f32 %v1206_v35, %v1205_v32 }
 0x104   :  { %v1287_v38 = vadd.f32 %v1286_v36, %v1285_v33  ;;  %v1208_v39 = vpop.f32.mrf.mxu0 }
 0x105   :  { %v1288_v40 = vpop.f32.mrf.mxu1  ;;  %v408_v41 = vadd.f32 %v1207_v37, %v1730_v34 }
 0x106   :  { %v1209_v42 = vpop.f32.mrf.mxu0 }
 0x107   :  { %v1289_v43 = vpop.f32.mrf.mxu1  ;;  %v1733_v44 = vadd.f32 %v1287_v38, %v408_v41  ;;  %v1210_v45 = vadd.f32 %v1209_v42, %v1208_v39 }
 0x108   :  { %v1290_v46 = vadd.f32 %v1289_v43, %v1288_v40  ;;  %v1211_v47 = vpop.f32.mrf.mxu0 }
 0x109   :  { %v1291_v48 = vpop.f32.mrf.mxu1  ;;  %v413_v49 = vadd.f32 %v1210_v45, %v1730_v34 }
 0x10a   :  { %v1212_v50 = vpop.f32.mrf.mxu0 }
 0x10b   :  { %v1292_v51 = vpop.f32.mrf.mxu1  ;;  %v1736_v52 = vadd.f32 %v1290_v46, %v413_v49  ;;  %v1213_v53 = vadd.f32 %v1212_v50, %v1211_v47 }
 0x10c   :  { %v1293_v54 = vadd.f32 %v1292_v51, %v1291_v48  ;;  %v1214_v55 = vpop.f32.mrf.mxu0 }
 0x10d   :  { %v1294_v56 = vpop.f32.mrf.mxu1  ;;  %v418_v57 = vadd.f32 %v1213_v53, %v1730_v34 }
 0x10e   :  { %v1215_v58 = vpop.f32.mrf.mxu0 }
 0x10f   :  { %v1295_v59 = vpop.f32.mrf.mxu1  ;;  %v1739_v60 = vadd.f32 %v1293_v54, %v418_v57  ;;  %v1216_v61 = vadd.f32 %v1215_v58, %v1214_v55 }
 0x110   :  { %v1296_v62 = vadd.f32 %v1295_v59, %v1294_v56  ;;  %v1217_v63 = vpop.f32.mrf.mxu0 }
 0x111   :  { %v1297_v0 = vpop.f32.mrf.mxu1  ;;  %v423_v1 = vadd.f32 %v1216_v61, %v1730_v34 }
 0x112   :  { %v1218_v2 = vpop.f32.mrf.mxu0 }
 0x113   :  { %v1298_v3 = vpop.f32.mrf.mxu1  ;;  %v1742_v4 = vadd.f32 %v1296_v62, %v423_v1  ;;  %v1219_v5 = vadd.f32 %v1218_v2, %v1217_v63 }
 0x114   :  { %v1299_v6 = vadd.f32 %v1298_v3, %v1297_v0  ;;  %v1220_v7 = vpop.f32.mrf.mxu0 }
 0x115   :  { %v1300_v8 = vpop.f32.mrf.mxu1  ;;  %v428_v9 = vadd.f32 %v1219_v5, %v1730_v34 }
 0x116   :  { %v1221_v10 = vpop.f32.mrf.mxu0 }
 0x117   :  { %v1301_v11 = vpop.f32.mrf.mxu1  ;;  %v1745_v12 = vadd.f32 %v1299_v6, %v428_v9  ;;  %v1222_v13 = vadd.f32 %v1221_v10, %v1220_v7 }
 0x118   :  { %v1302_v14 = vadd.f32 %v1301_v11, %v1300_v8  ;;  %v1223_v15 = vpop.f32.mrf.mxu0 }
 0x119   :  { %v1303_v16 = vpop.f32.mrf.mxu1  ;;  %v433_v17 = vadd.f32 %v1222_v13, %v1730_v34 }
 0x11a   :  { %v1224_v18 = vpop.f32.mrf.mxu0 }
 0x11b   :  { %v1304_v19 = vpop.f32.mrf.mxu1  ;;  %v1748_v20 = vadd.f32 %v1302_v14, %v433_v17  ;;  %v1225_v21 = vadd.f32 %v1224_v18, %v1223_v15 }
 0x11c   :  { %v1305_v22 = vadd.f32 %v1304_v19, %v1303_v16  ;;  %v1226_v23 = vpop.f32.mrf.mxu0 }
 0x11d   :  { %v1306_v24 = vpop.f32.mrf.mxu1  ;;  %v438_v25 = vadd.f32 %v1225_v21, %v1730_v34 }
 0x11e   :  { %v1227_v26 = vpop.f32.mrf.mxu0 }
 0x11f   :  { %v1307_v27 = vpop.f32.mrf.mxu1  ;;  %v1751_v28 = vadd.f32 %v1305_v22, %v438_v25  ;;  %v1228_v29 = vadd.f32 %v1227_v26, %v1226_v23 }
 0x120   :  { %v1308_v30 = vadd.f32 %v1307_v27, %v1306_v24  ;;  %v1229_v31 = vpop.f32.mrf.mxu0 }
 0x121   :  { %1930 = vst [vmem:[#allocation11_spill] sm:$0xff] %v1751_v28  ;;  %v1309_v32 = vpop.f32.mrf.mxu1  ;;  %v443_v33 = vadd.f32 %v1228_v29, %v1730_v34 }
 0x122   :  { %v1230_v35 = vpop.f32.mrf.mxu0 }
 0x123   :  { %v1310_v36 = vpop.f32.mrf.mxu1  ;;  %v1754_v37 = vadd.f32 %v1308_v30, %v443_v33  ;;  %v1231_v38 = vadd.f32 %v1230_v35, %v1229_v31 }
 0x124   :  { %v1311_v39 = vadd.f32 %v1310_v36, %v1309_v32  ;;  %v1232_v40 = vpop.f32.mrf.mxu0 }
 0x125   :  { %1931 = vst [vmem:[#allocation12_spill] sm:$0xff] %v1754_v37  ;;  %v1312_v41 = vpop.f32.mrf.mxu1  ;;  %v448_v42 = vadd.f32 %v1231_v38, %v1730_v34 }
 0x126   :  { %v1233_v43 = vpop.f32.mrf.mxu0 }
 0x127   :  { %v1313_v45 = vpop.f32.mrf.mxu1  ;;  %v1757_v46 = vadd.f32 %v1311_v39, %v448_v42  ;;  %v1234_v47 = vadd.f32 %v1233_v43, %v1232_v40 }
 0x128   :  { %v1314_v48 = vadd.f32 %v1313_v45, %v1312_v41  ;;  %v1235_v49 = vpop.f32.mrf.mxu0 }
 0x129   :  { %v1315_v50 = vpop.f32.mrf.mxu1  ;;  %v453_v51 = vadd.f32 %v1234_v47, %v1730_v34 }
 0x12a   :  { %v1236_v53 = vpop.f32.mrf.mxu0 }
 0x12b   :  { %v1316_v54 = vpop.f32.mrf.mxu1  ;;  %v1760_v55 = vadd.f32 %v1314_v48, %v453_v51  ;;  %v1237_v56 = vadd.f32 %v1236_v53, %v1235_v49 }
 0x12c   :  { %v1317_v57 = vadd.f32 %v1316_v54, %v1315_v50  ;;  %v1238_v58 = vpop.f32.mrf.mxu0 }
 0x12d   :  { %v1318_v59 = vpop.f32.mrf.mxu1  ;;  %v458_v61 = vadd.f32 %v1237_v56, %v1730_v34 }
 0x12e   :  { %v1239_v62 = vpop.f32.mrf.mxu0 }
 0x12f   :  { %v1319_v63 = vpop.f32.mrf.mxu1  ;;  %v1763_v0 = vadd.f32 %v1317_v57, %v458_v61  ;;  %v1240_v1 = vadd.f32 %v1239_v62, %v1238_v58 }
 0x130   :  { %v1320_v2 = vadd.f32 %v1319_v63, %v1318_v59  ;;  %v1241_v3 = vpop.f32.mrf.mxu0 }
 0x131   :  { %v1321_v5 = vpop.f32.mrf.mxu1  ;;  %v463_v6 = vadd.f32 %v1240_v1, %v1730_v34 }
 0x132   :  { %v1242_v7 = vpop.f32.mrf.mxu0 }
 0x133   :  { %v1322_v8 = vpop.f32.mrf.mxu1  ;;  %v1766_v9 = vadd.f32 %v1320_v2, %v463_v6  ;;  %v1243_v10 = vadd.f32 %v1242_v7, %v1241_v3 }
 0x134   :  { %v1323_v11 = vadd.f32 %v1322_v8, %v1321_v5  ;;  %v1244_v13 = vpop.f32.mrf.mxu0 }
 0x135   :  { %v1324_v14 = vpop.f32.mrf.mxu1  ;;  %v468_v15 = vadd.f32 %v1243_v10, %v1730_v34 }
 0x136   :  { %v1245_v16 = vpop.f32.mrf.mxu0 }
 0x137   :  { %v1325_v17 = vpop.f32.mrf.mxu1  ;;  %v1769_v18 = vadd.f32 %v1323_v11, %v468_v15  ;;  %v1246_v19 = vadd.f32 %v1245_v16, %v1244_v13 }
 0x138   :  { %v1326_v21 = vadd.f32 %v1325_v17, %v1324_v14  ;;  %v1247_v22 = vpop.f32.mrf.mxu0 }
 0x139   :  { %v1327_v23 = vpop.f32.mrf.mxu1  ;;  %v473_v24 = vadd.f32 %v1246_v19, %v1730_v34 }
 0x13a   :  { %v1248_v25 = vpop.f32.mrf.mxu0 }
 0x13b   :  { %v1328_v26 = vpop.f32.mrf.mxu1  ;;  %v1772_v27 = vadd.f32 %v1326_v21, %v473_v24  ;;  %v1249_v29 = vadd.f32 %v1248_v25, %v1247_v22 }
 0x13c   :  { %v1329_v30 = vadd.f32 %v1328_v26, %v1327_v23  ;;  %v1250_v31 = vpop.f32.mrf.mxu0 }
 0x13d   :  { %v1330_v32 = vpop.f32.mrf.mxu1  ;;  %v478_v33 = vadd.f32 %v1249_v29, %v1730_v34 }
 0x13e   :  { %v1251_v35 = vpop.f32.mrf.mxu0 }
 0x13f   :  { %v1331_v36 = vpop.f32.mrf.mxu1  ;;  %v1775_v38 = vadd.f32 %v1329_v30, %v478_v33  ;;  %v1252_v39 = vadd.f32 %v1251_v35, %v1250_v31 }
 0x140   :  { %v1332_v40 = vadd.f32 %v1331_v36, %v1330_v32  ;;  %v1365_v41 = vpop.f32.mrf.mxu0 }
 0x141   :  { %1932 = vst [vmem:[#allocation13_spill] sm:$0xff] %v1775_v38  ;;  %v1445_v42 = vpop.f32.mrf.mxu1  ;;  %v483_v43 = vadd.f32 %v1252_v39, %v1730_v34 }
 0x142   :  { %v1366_v45 = vpop.f32.mrf.mxu0 }
 0x143   :  { %v1446_v47 = vpop.f32.mrf.mxu1  ;;  %v1778_v48 = vadd.f32 %v1332_v40, %v483_v43  ;;  %v1367_v49 = vadd.f32 %v1366_v45, %v1365_v41 }
 0x144   :  { %v1368_v50 = vpop.f32.mrf.mxu0  ;;  %v1447_v54 = vadd.f32 %v1446_v47, %v1445_v42 }
 0x145   :  { %1933 = vst [vmem:[#allocation14_spill] sm:$0xff] %v1778_v48  ;;  %v1780_v51 = vpop.f32.mrf.mxu1  ;;  %v698_v53 = vadd.f32 %v1367_v49, %v1733_v44 }
 0x146   :  { %v1369_v56 = vpop.f32.mrf.mxu0 }
 0x147   :  { %v1783_v57 = vpop.f32.mrf.mxu1  ;;  %v1785_v58 = vadd.f32 %v1447_v54, %v698_v53  ;;  %v1370_v38 = vadd.f32 %v1369_v56, %v1368_v50 }
 0x148   :  { %v1371_v59 = vpop.f32.mrf.mxu0  ;;  %v1450_v50 = vadd.f32 %v1783_v57, %v1780_v51 }
 0x149   :  { %v1451_v61 = vpop.f32.mrf.mxu1  ;;  %v703_v28 = vadd.f32 %v1370_v38, %v1736_v52 }
 0x14a   :  { %v1372_v62 = vpop.f32.mrf.mxu0 }
 0x14b   :  { %v1452_v34 = vpop.f32.mrf.mxu1  ;;  %v1373_v63 = vadd.f32 %v1372_v62, %v1371_v59  ;;  %v848_v38 = vadd.f32 %v1450_v50, %v703_v28 }
 0x14c   :  { %v1374_v1 = vpop.f32.mrf.mxu0  ;;  %v1453_v5 = vadd.f32 %v1452_v34, %v1451_v61 }
 0x14d   :  { %v1787_v2 = vpop.f32.mrf.mxu1  ;;  %v708_v3 = vadd.f32 %v1373_v63, %v1739_v60 }
 0x14e   :  { %v1375_v6 = vpop.f32.mrf.mxu0 }
 0x14f   :  { %v1790_v7 = vpop.f32.mrf.mxu1  ;;  %v1792_v44 = vadd.f32 %v1453_v5, %v708_v3 }
 0x150   :  { %v1794_v8 = vpop.f32.mrf.mxu0 }
 0x151   :  { %v1796_v10 = vpop.f32.mrf.mxu1 }
 0x152   :  { %v1798_v11 = vpop.f32.mrf.mxu0 }
 0x153   :  { %v1800_v13 = vpop.f32.mrf.mxu1 }
 0x154   :  { %v1802_v14 = vpop.f32.mrf.mxu0 }
 0x155   :  { %v1804_v15 = vpop.f32.mrf.mxu1 }
 0x156   :  { %v1806_v16 = vpop.f32.mrf.mxu0 }
 0x157   :  { %v1808_v60 = vpop.f32.mrf.mxu1 }
 0x158   :  { %v1810_v17 = vpop.f32.mrf.mxu0 }
 0x159   :  { %v1812_v19 = vpop.f32.mrf.mxu1 }
 0x15a   :  { %1934 = vst [vmem:[#allocation15_spill] sm:$0xff] %v1812_v19  ;;  %v1814_v21 = vpop.f32.mrf.mxu0 }
 0x15b   :  { %v1816_v22 = vpop.f32.mrf.mxu1 }
 0x15c   :  { %1935 = vst [vmem:[#allocation16_spill] sm:$0xff] %v1816_v22  ;;  %v1818_v23 = vpop.f32.mrf.mxu0  ;;  %v1376_v22 = vadd.f32 %v1375_v6, %v1374_v1 }
 0x15d   :  { %v1820_v24 = vpop.f32.mrf.mxu1 }
 0x15e   :  { %1936 = vst [vmem:[#allocation17_spill] sm:$0xff] %v1820_v24  ;;  %v1822_v25 = vpop.f32.mrf.mxu0  ;;  %v713_v1 = vadd.f32 %v1376_v22, %v1742_v4  ;;  %v1379_v4 = vadd.f32 %v1798_v11, %v1794_v8 }
 0x15f   :  { %1937 = vst [vmem:[#allocation18_spill] sm:$0xff] %v1822_v25  ;;  %v1824_v26 = vpop.f32.mrf.mxu1 }
 0x160   :  { %1938 = vst [vmem:[#allocation19_spill] sm:$0xff] %v1824_v26  ;;  %v1389_v29 = vpop.f32.mrf.mxu0 }
 0x161   :  { %v1469_v30 = vpop.f32.mrf.mxu1 }
 0x162   :  { %v1390_v31 = vpop.f32.mrf.mxu0 }
 0x163   :  { %v1470_v32 = vpop.f32.mrf.mxu1 }
 0x164   :  { %v1392_v33 = vpop.f32.mrf.mxu0  ;;  %v1471_v51 = vadd.f32 %v1470_v32, %v1469_v30 }
 0x165   :  { %v1472_v35 = vpop.f32.mrf.mxu1 }
 0x166   :  { %v1393_v36 = vpop.f32.mrf.mxu0 }
 0x167   :  { %v1473_v39 = vpop.f32.mrf.mxu1  ;;  %v1394_v48 = vadd.f32 %v1393_v36, %v1392_v33 }
 0x168   :  { %v1395_v40 = vpop.f32.mrf.mxu0  ;;  %v1474_v56 = vadd.f32 %v1473_v39, %v1472_v35 }
 0x169   :  { %v1475_v41 = vpop.f32.mrf.mxu1 }
 0x16a   :  { %v1396_v42 = vpop.f32.mrf.mxu0 }
 0x16b   :  { %v1476_v43 = vpop.f32.mrf.mxu1 }
 0x16c   :  { %v1398_v45 = vpop.f32.mrf.mxu0 }
 0x16d   :  { %v1478_v47 = vpop.f32.mrf.mxu1 }
 0x16e   :  { %v1399_v49 = vpop.f32.mrf.mxu0 }
 0x16f   :  { %v1479_v53 = vpop.f32.mrf.mxu1 }
 0x170   :  { %v1401_v54 = vpop.f32.mrf.mxu0  ;;  %v1480_v22 = vadd.f32 %v1479_v53, %v1478_v47 }
 0x171   :  { %v1826_v59 = vpop.f32.mrf.mxu1 }
 0x172   :  { %1939 = vst [vmem:[#allocation20_spill] sm:$0xff] %v1826_v59  ;;  %v1402_v61 = vpop.f32.mrf.mxu0  ;;  %v743_v59 = vadd.f32 %v1394_v48, %v1760_v55  ;;  %v1456_v55 = vadd.f32 %v1790_v7, %v1787_v2  ;;  %v1397_v48 = vadd.f32 %v1396_v42, %v1395_v40  ;;  %v1382_v7 = vadd.f32 %v1806_v16, %v1802_v14 }
 0x173   :  { %v1828_v62 = vpop.f32.mrf.mxu1  ;;  %v1477_v40 = vadd.f32 %v1476_v43, %v1475_v41  ;;  %v1459_v43 = vadd.f32 %v1800_v13, %v1796_v10  ;;  %v1385_v10 = vadd.f32 %v1814_v21, %v1810_v17  ;;  %v1943_v13 = vld [vmem:[#allocation18_spill] sm:$0xff] }
 0x174   :  { %1940 = vst [vmem:[#allocation21_spill] sm:$0xff] %v1828_v62  ;;  %v1404_v34 = vpop.f32.mrf.mxu0  ;;  %v1391_v62 = vadd.f32 %v1390_v31, %v1389_v29  ;;  %v888_v29 = vadd.f32 %v1474_v56, %v743_v59  ;;  %v748_v30 = vadd.f32 %v1397_v48, %v1763_v0  ;;  %v723_v0 = vadd.f32 %v1382_v7, %v1748_v20  ;;  %v1948_v7 = vld [vmem:[#allocation11_spill] sm:$0xff] }
 0x175   :  { %v1830_v63 = vpop.f32.mrf.mxu1 }
 0x176   :  { %1941 = vst [vmem:[#allocation22_spill] sm:$0xff] %v1830_v63  ;;  %v1405_v3 = vpop.f32.mrf.mxu0  ;;  %v1400_v63 = vadd.f32 %v1399_v49, %v1398_v45  ;;  %v738_v52 = vadd.f32 %v1391_v62, %v1757_v46  ;;  %v858_v46 = vadd.f32 %v1456_v55, %v713_v1  ;;  %v1462_v55 = vadd.f32 %v1808_v60, %v1804_v15 }
 0x177   :  { %v1832_v5 = vpop.f32.mrf.mxu1  ;;  %v1406_v14 = vadd.f32 %v1405_v3, %v1404_v34  ;;  %v1388_v15 = vadd.f32 %v1943_v13, %v1818_v23 }
 0x178   :  { %1942 = vst [vmem:[#allocation23_spill] sm:$0xff] %v1832_v5  ;;  %v1834_v26 = vpop.f32.mrf.mxu0  ;;  %v753_v31 = vadd.f32 %v1400_v63, %v1766_v9  ;;  %v883_v2 = vadd.f32 %v1471_v51, %v738_v52  ;;  %v1865_v9 = vld [vmem:[%s1928_s3] ss:$0 sm:$0xff]  ;;  %v718_v52 = vadd.f32 %v1379_v4, %v1745_v12  ;;  %s1692_s3 = smov [#allocation7]  }
 0x179   :  { %v1836_v24 = vpop.f32.mrf.mxu1  ;;  %v763_v3 = vadd.f32 %v1406_v14, %v1772_v27  ;;  %v1944_v60 = vld [vmem:[#allocation20_spill] sm:$0xff]  ;;  %s1158_s30 = sshll.u32 %s1692_s3, 4  ;;  %s1159_s30 = int_to_ptr.vmem [resolvable:$true] %s1158_s30 }
 0x17a   :  { %v1838_v19 = vpop.f32.mrf.mxu0  ;;  %v898_v11 = vadd.f32 %v1480_v22, %v753_v31  ;;  %s1660_s5 = scalar_lea.vmem %s1159_s30, 2048  ;;  %p1665_p11 = scmp.lt.s32.totalorder %s1159_s30, %s1159_s30 }
 0x17b   :  { %v1840_v37 = vpop.f32.mrf.mxu1  ;;  %p1661_p10 = scmp.ne.s32.totalorder %s1159_s30, %s1660_s5  ;;  %p1666_p12 = scmp.lt.s32.totalorder %s1660_s5, %s1660_s5 }
 0x17c   :  { %v1844_v25 = vpop.f32.mrf.mxu0 }
 0x17d   :  { %v1846_v5 = vpop.f32.mrf.mxu1  ;;  %v1946_v4 = vld [vmem:[#allocation22_spill] sm:$0xff]  ;;  %p1667_p13 = por %p1666_p12, %p1665_p11 }
 0x17e   :  { %v1851_v6 = vpop.f32.mrf.mxu0 }
 0x17f   :  { %v1853_v33 = vpop.f32.mrf.mxu1  ;;  %v1947_v22 = vld [vmem:[#allocation23_spill] sm:$0xff]  ;;  %v1412_v21 = vadd.f32 %v1851_v6, %v1844_v25  ;;  %p1668_p0 = pnand %p1667_p13, %p1661_p10 }
 0x180   :  { %v1559_v36 = vpop.f32.mrf.mxu0 }
 0x181   :  { %v1571_v45 = vpop.f32.mrf.mxu1  ;;  %v993_v57 = vadd.f32 %v1559_v36, %v848_v38  ;;  %v1403_v38 = vadd.f32 %v1402_v61, %v1401_v54 }
 0x182   :  { %v1033_v35 = vadd.f32 %v1571_v45, %v888_v29  ;;  %v987_v39 = vpop.f32.mrf.mxu0  ;;  %v893_v29 = vadd.f32 %v1477_v40, %v748_v30  ;;  %v863_v45 = vadd.f32 %v1459_v43, %v718_v52  ;;  %v728_v30 = vadd.f32 %v1385_v10, %v1948_v7  ;;  %v1950_v40 = vld [vmem:[#allocation15_spill] sm:$0xff] }
 0x183   :  { %v1027_v49 = vpop.f32.mrf.mxu1  ;;  %v1067_v28 = vmax.f32 %v993_v57, 0.0  ;;  %v988_v62 = vadd.f32 %v987_v39, %v1785_v58  ;;  %v758_v34 = vadd.f32 %v1403_v38, %v1769_v18  ;;  %v1945_v57 = vld [vmem:[#allocation21_spill] sm:$0xff]  ;;  %v1486_v39 = vadd.f32 %v1947_v22, %v1946_v4  ;;  %v1954_v38 = vld [vmem:[#allocation14_spill] sm:$0xff] }
 0x184   :  { %v1075_v59 = vmax.f32 %v1033_v35, 0.0  ;;  %v1562_v8 = vpop.f32.mrf.mxu0  ;;  %v1028_v42 = vadd.f32 %v1027_v49, %v883_v2  ;;  %v1483_v35 = vadd.f32 %v1945_v57, %v1944_v60  ;;  %v773_v14 = vadd.f32 %v1412_v21, %v1954_v38 }
 0x185   :  { %v1574_v32 = vpop.f32.mrf.mxu1  ;;  %v1003_v47 = vadd.f32 %v1562_v8, %v858_v46  ;;  %v1066_v53 = vmax.f32 %v988_v62, 0.0  ;;  %v1090_v1 = vmul.f32 %v1865_v9, %v1067_v28  ;;  %v908_v23 = vadd.f32 %v1486_v39, %v763_v3  ;;  %v1949_v8 = vld [vmem:[#allocation12_spill] sm:$0xff] }
 0x186   :  { %v1043_v63 = vadd.f32 %v1574_v32, %v898_v11  ;;  %v997_v58 = vpop.f32.mrf.mxu0  ;;  %v1098_v56 = vmul.f32 %v1865_v9, %v1075_v59  ;;  %v1074_v48 = vmax.f32 %v1028_v42, 0.0  ;;  %v903_v62 = vadd.f32 %v1483_v35, %v758_v34  ;;  %v1951_v42 = vld [vmem:[#allocation16_spill] sm:$0xff] }
 0x187   :  { %v1037_v50 = vpop.f32.mrf.mxu1  ;;  %v1069_v16 = vmax.f32 %v1003_v47, 0.0  ;;  %1107 = vadd.xlane.f32.xlu0 %v1090_v1  ;;  %v998_v31 = vadd.f32 %v997_v58, %v1792_v44  ;;  %v1089_v20 = vmul.f32 %v1865_v9, %v1066_v53  ;;  %v868_v44 = vadd.f32 %v1462_v55, %v723_v0  ;;  %v1952_v53 = vld [vmem:[#allocation17_spill] sm:$0xff] }
 0x188   :  { %1123 = vadd.xlane.f32.xlu1 %v1098_v56  ;;  %v1565_v41 = vpop.f32.mrf.mxu0  ;;  %v1077_v36 = vmax.f32 %v1043_v63, 0.0  ;;  %v1038_v12 = vadd.f32 %v1037_v50, %v893_v29  ;;  %v1097_v27 = vmul.f32 %v1865_v9, %v1074_v48  ;;  %v733_v11 = vadd.f32 %v1388_v15, %v1949_v8  ;;  %v1953_v63 = vld [vmem:[#allocation19_spill] sm:$0xff] }
 0x189   :  { %v1577_v54 = vpop.f32.mrf.mxu1  ;;  %v1092_v61 = vmul.f32 %v1865_v9, %v1069_v16  ;;  %v1068_v18 = vmax.f32 %v998_v31, 0.0  ;;  %v1013_v46 = vadd.f32 %v1565_v41, %v868_v44  ;;  %v1409_v32 = vadd.f32 %v1838_v19, %v1834_v26  ;;  %v1955_v26 = vld [vmem:[#allocation13_spill] sm:$0xff] }
 0x18a   :  { %v1007_v51 = vpop.f32.mrf.mxu0  ;;  %v1076_v49 = vmax.f32 %v1038_v12, 0.0  ;;  %v1100_v17 = vmul.f32 %v1865_v9, %v1077_v36  ;;  %v1465_v47 = vadd.f32 %v1951_v42, %v1950_v40  ;;  %v1468_v58 = vadd.f32 %v1953_v63, %v1952_v53 }
 0x18b   :  { %1105 = vadd.xlane.f32.xlu0 %v1089_v20  ;;  %v1008_v28 = vadd.f32 %v1007_v51, %v863_v45  ;;  %v1047_v59 = vpop.f32.mrf.mxu1  ;;  %v1053_v50 = vadd.f32 %v1577_v54, %v908_v23  ;;  %v1071_v6 = vmax.f32 %v1013_v46, 0.0  ;;  %v1091_v1 = vmul.f32 %v1865_v9, %v1068_v18 }
 0x18c   :  { %1111 = vadd.xlane.f32.xlu1 %v1092_v61  ;;  %v1568_v2 = vpop.f32.mrf.mxu0  ;;  %v1048_v25 = vadd.f32 %v1047_v59, %v903_v62  ;;  %v1099_v52 = vmul.f32 %v1865_v9, %v1076_v49  ;;  %v768_v0 = vadd.f32 %v1409_v32, %v1955_v26  ;;  %v878_v29 = vadd.f32 %v1468_v58, %v733_v11 }
 0x18d   :  { %v1070_v56 = vmax.f32 %v1008_v28, 0.0  ;;  %v1580_v16 = vpop.f32.mrf.mxu1  ;;  %v873_v41 = vadd.f32 %v1465_v47, %v728_v30  ;;  %v1489_v43 = vadd.f32 %v1840_v37, %v1836_v24  ;;  %v1492_v55 = vadd.f32 %v1853_v33, %v1846_v5 }
 0x18e   :  { %v1017_v19 = vpop.f32.mrf.mxu0  ;;  %v1079_v48 = vmax.f32 %v1053_v50, 0.0  ;;  %v1078_v31 = vmax.f32 %v1048_v25, 0.0  ;;  %v1023_v36 = vadd.f32 %v1568_v2, %v878_v29  ;;  %v1094_v54 = vmul.f32 %v1865_v9, %v1071_v6 }
 0x18f   :  { %1121 = vadd.xlane.f32.xlu0 %v1097_v27  ;;  %v1018_v12 = vadd.f32 %v1017_v19, %v873_v41  ;;  %v1093_v61 = vmul.f32 %v1865_v9, %v1070_v56  ;;  %v918_v20 = vadd.f32 %v1492_v55, %v773_v14  ;;  %v1057_v34 = vpop.f32.mrf.mxu1  ;;  %v913_v3 = vadd.f32 %v1489_v43, %v768_v0 }
 0x190   :  { %1127 = vadd.xlane.f32.xlu1 %v1100_v17  ;;  %v1102_v51 = vmul.f32 %v1865_v9, %v1079_v48  ;;  %v1073_v37 = vmax.f32 %v1023_v36, 0.0  ;;  %v1101_v5 = vmul.f32 %v1865_v9, %v1078_v31 }
 0x191   :  { %v1063_v45 = vadd.f32 %v1580_v16, %v918_v20  ;;  %v1072_v24 = vmax.f32 %v1018_v12, 0.0  ;;  %v1058_v10 = vadd.f32 %v1057_v34, %v913_v3 }
 0x192   :  { %v1096_v15 = vmul.f32 %v1865_v9, %v1073_v37 }
 0x193   :  { %1125 = vadd.xlane.f32.xlu0 %v1099_v52  ;;  %v1081_v33 = vmax.f32 %v1063_v45, 0.0  ;;  %v1080_v13 = vmax.f32 %v1058_v10, 0.0  ;;  %v1095_v44 = vmul.f32 %v1865_v9, %v1072_v24 }
 0x194   :  { %1109 = vadd.xlane.f32.xlu1 %v1091_v1 }
 0x195   :  { %v1104_v60 = vmul.f32 %v1865_v9, %v1081_v33  ;;  %v1103_v57 = vmul.f32 %v1865_v9, %v1080_v13 }
 0x197   :  { %1113 = vadd.xlane.f32.xlu0 %v1093_v61 }
 0x198   :  { %1115 = vadd.xlane.f32.xlu1 %v1094_v54 }
 0x19b   :  { %1129 = vadd.xlane.f32.xlu0 %v1101_v5 }
 0x19c   :  { %1131 = vadd.xlane.f32.xlu1 %v1102_v51 }
 0x19f   :  { %1117 = vadd.xlane.f32.xlu0 %v1095_v44 }
 0x1a0   :  { %1119 = vadd.xlane.f32.xlu1 %v1096_v15 }
 0x1a3   :  { %1133 = vadd.xlane.f32.xlu0 %v1103_v57 }
 0x1a4   :  { %1135 = vadd.xlane.f32.xlu1 %v1104_v60 }
 0x210   :  { %v1108_v4 = vpop.xlane.xlu0 %1107 }
 0x211   :  { %v1124_v35 = vpop.xlane.xlu1 %1123  ;;  %1138 = vst [vmem:[#allocation7 + $0x8] sm:$0xff] %v1108_v4 }
 0x212   :  { %1146 = vst [vmem:[#allocation7 + $0x48] sm:$0xff] %v1124_v35 }
 0x214   :  { %v1106_v39 = vpop.xlane.xlu0 %1105 }
 0x215   :  { %v1112_v22 = vpop.xlane.xlu1 %1111  ;;  %1137 = vst [vmem:[#allocation7] sm:$0xff] %v1106_v39 }
 0x216   :  { %1140 = vst [vmem:[#allocation7 + $0x18] sm:$0xff] %v1112_v22 }
 0x218   :  { %v1122_v27 = vpop.xlane.xlu0 %1121 }
 0x219   :  { %v1128_v18 = vpop.xlane.xlu1 %1127  ;;  %1145 = vst [vmem:[#allocation7 + $0x40] sm:$0xff] %v1122_v27 }
 0x21a   :  { %1148 = vst [vmem:[#allocation7 + $0x58] sm:$0xff] %v1128_v18 }
 0x21c   :  { %v1126_v46 = vpop.xlane.xlu0 %1125 }
 0x21d   :  { %v1110_v49 = vpop.xlane.xlu1 %1109  ;;  %1147 = vst [vmem:[#allocation7 + $0x50] sm:$0xff] %v1126_v46 }
 0x21e   :  { %1139 = vst [vmem:[#allocation7 + $0x10] sm:$0xff] %v1110_v49 }
 0x220   :  { %v1114_v9 = vpop.xlane.xlu0 %1113 }
 0x221   :  { %v1116_v28 = vpop.xlane.xlu1 %1115  ;;  %1141 = vst [vmem:[#allocation7 + $0x20] sm:$0xff] %v1114_v9 }
 0x222   :  { %1142 = vst [vmem:[#allocation7 + $0x28] sm:$0xff] %v1116_v28 }
 0x224   :  { %v1130_v17 = vpop.xlane.xlu0 %1129 }
 0x225   :  { %v1132_v59 = vpop.xlane.xlu1 %1131  ;;  %1149 = vst [vmem:[#allocation7 + $0x60] sm:$0xff] %v1130_v17 }
 0x226   :  { %1150 = vst [vmem:[#allocation7 + $0x68] sm:$0xff] %v1132_v59 }
 0x228   :  { %v1118_v23 = vpop.xlane.xlu0 %1117 }
 0x229   :  { %v1120_v21 = vpop.xlane.xlu1 %1119  ;;  %1143 = vst [vmem:[#allocation7 + $0x30] sm:$0xff] %v1118_v23 }
 0x22a   :  { %1144 = vst [vmem:[#allocation7 + $0x38] sm:$0xff] %v1120_v21 }
 0x22c   :  { %v1134_v2 = vpop.xlane.xlu0 %1133 }
 0x22d   :  { %v1136_v62 = vpop.xlane.xlu1 %1135  ;;  %1151 = vst [vmem:[#allocation7 + $0x70] sm:$0xff] %v1134_v2 }
 0x22e   :  { %1152 = vst [vmem:[#allocation7 + $0x78] sm:$0xff] %v1136_v62 }
 0x22f   :  { %1671 = shalt.err (!%p1668_p0)
}
 0x230   :  { %1164 = dma.vmem_to_hbm [thread:$0]  %s1159_s30, 2048, %s1929_s4, [#allocation4], %s1690_s25, %s1690_s25, %s1691_s26  }
 0x231   :  { %1684 = dma.done.wait [#allocation4], 2048  }
 0x232   :  { %1685 = vsyncadd [#allocation4], 4294965248 }
 0x233   :  { %1168 = vsyncpa [#allocation3], 1 }
 0x234   :  { %1169 = vsyncpa [#allocation6], 1 }
 0x235   :  { %1170 = vsyncpa [#allocation4], 1 }

</bundles_post_ra>
